<compile_context>
chip_gen: v5e
topology: v5e:2x2
jax: 0.10.0
libtpu: 0.0.40
codegen_flags: <defaults>
</compile_context>

<pallas_src>
import functools

import jax
import jax.numpy as jnp
from jax.experimental import pallas as pl
from jax.experimental.pallas import tpu as pltpu


def _round_up(x, m):
    return (x + m - 1) // m * m


# ----------------------------------------------------------------------------
# Kernel 1: point encoder   feat_t = relu(W_enc^T @ x_t + b_enc^T)
# Transposed layout: channels on sublanes, points on lanes -> lane-dense stores.
# ----------------------------------------------------------------------------
def _encoder_kernel(x_ref, w_ref, b_ref, o_ref):
    x = x_ref[...]                       # (3, tm) f32
    w = w_ref[...]                       # (H, 3) f32
    # K=3 contraction as rank-1 VPU updates (too small to be worth an MXU pass)
    acc = b_ref[...] + w[:, 0:1] * x[0:1, :]
    acc = acc + w[:, 1:2] * x[1:2, :]
    acc = acc + w[:, 2:3] * x[2:3, :]
    o_ref[...] = jnp.maximum(acc, 0.0).astype(o_ref.dtype)


def encoder_linear(x_t, w_t, b_t, block_m):
    k, n_p = x_t.shape
    h = w_t.shape[0]
    return pl.pallas_call(
        _encoder_kernel,
        out_shape=jax.ShapeDtypeStruct((h, n_p), jnp.bfloat16),
        grid_spec=pltpu.PrefetchScalarGridSpec(
            num_scalar_prefetch=0,
            grid=(n_p // block_m,),
            in_specs=[
                pl.BlockSpec((k, block_m), lambda i: (0, i)),
                pl.BlockSpec((h, k), lambda i: (0, 0)),
                pl.BlockSpec((h, 1), lambda i: (0, 0)),
            ],
            out_specs=pl.BlockSpec((h, block_m), lambda i: (0, i)),
        ),
        compiler_params=pltpu.CompilerParams(
            dimension_semantics=("parallel",)),
    )(x_t, w_t, b_t)


# ----------------------------------------------------------------------------
# Kernel 2: factorized grid conv (b_xc_y_z): 5x5 conv over (Y, Z), channels = X*C.
# Grid = (y_tiles 'parallel', ksize di-steps 'arbitrary'):
#   * weights streamed per di as (1, 5*XC, XC) bf16 blocks (VMEM constant in XC),
#   * the 5 dj sublane shifts are hoisted: built once per Y tile into a VMEM slab
#     under pl.when(di==0), with the 5 dj taps concatenated along K (K-fused MXU dot),
#   * f32 accumulator in scratch, bias+ReLU+bf16 store under pl.when(di==last).
# ----------------------------------------------------------------------------
def _conv_kernel(gp_ref, w_ref, b_ref, o_ref, acc_ref, shift_ref, *,
                 ty, gz, xc, ksize):
    di = pl.program_id(1)
    y0 = pl.program_id(0) * ty
    halo_rows = ty + ksize - 1

    @pl.when(di == 0)
    def _():
        acc_ref[...] = jnp.zeros_like(acc_ref)
        # Build the dj-shifted, K-concatenated halo slab ONCE per Y tile
        # (5 unaligned sublane shifts per tile instead of 25).
        halo = gp_ref[pl.ds(y0, halo_rows), :, :]          # (ty+4, gzp, xc) bf16
        for dj in range(ksize):
            shift_ref[:, :, dj * xc:(dj + 1) * xc] = halo[:, dj:dj + gz, :]

    # leading-axis dynamic slice (cheap) + one big K-fused MXU dot per di
    x2 = shift_ref[pl.ds(di, ty), :, :].reshape(ty * gz, ksize * xc)
    acc_ref[...] += jnp.dot(x2, w_ref[0],
                            preferred_element_type=jnp.float32)

    @pl.when(di == ksize - 1)
    def _():
        r = jnp.maximum(acc_ref[...] + b_ref[...], 0.0)
        o_ref[...] = r.reshape(ty, gz, xc).astype(o_ref.dtype)


def factorized_conv(fac, w_conv, b_conv, ksize):
    gy, gz, xc = fac.shape
    pad = ksize // 2
    # bf16 inputs (halves the dominant DMA), f32 accumulation in-kernel.
    gp = jnp.pad(fac.astype(jnp.bfloat16), ((pad, pad), (pad, pad), (0, 0)))
    gyp, gzp = gy + 2 * pad, gz + 2 * pad

    # w_stream[di] = concat_dj w_conv[di*ks + dj]  -> (ks, ks*xc, xc), bf16
    w_stream = (w_conv.reshape(ksize, ksize, xc, xc)
                .reshape(ksize, ksize * xc, xc).astype(jnp.bfloat16))

    ty = 1
    for cand in (8, 4, 2, 1):
        if gy % cand == 0:
            ty = cand
            break

    kernel = functools.partial(_conv_kernel, ty=ty, gz=gz, xc=xc, ksize=ksize)
    # TODO(synk): at very large (Y,Z) plane resolutions, stream the padded grid per
    # Y tile with a halo DMA instead of keeping the full plane resident in VMEM.
    return pl.pallas_call(
        kernel,
        out_shape=jax.ShapeDtypeStruct((gy, gz, xc), jnp.bfloat16),
        grid_spec=pltpu.PrefetchScalarGridSpec(
            num_scalar_prefetch=0,
            grid=(gy // ty, ksize),
            in_specs=[
                # full padded plane, resident across the whole grid (constant index)
                pl.BlockSpec((gyp, gzp, xc), lambda yi, di: (0, 0, 0)),
                # one (ks*xc, xc) weight slab streamed per di step
                pl.BlockSpec((1, ksize * xc, xc), lambda yi, di: (di, 0, 0)),
                pl.BlockSpec((1, xc), lambda yi, di: (0, 0)),
            ],
            out_specs=pl.BlockSpec((ty, gz, xc), lambda yi, di: (yi, 0, 0)),
            scratch_shapes=[
                pltpu.VMEM((ty * gz, xc), jnp.float32),
                pltpu.VMEM((ty + ksize - 1, gz, ksize * xc), jnp.bfloat16),
            ],
        ),
        compiler_params=pltpu.CompilerParams(
            dimension_semantics=("parallel", "arbitrary")),
    )(gp, w_stream, b_conv)


# ----------------------------------------------------------------------------
# Kernel 3: fused per-point head (transposed layout).
#   hid_t = relu(W1^T @ [feat_t; samp_t] + b1^T)
#   out_t = W2^T @ hid_t + b2^T
# Intermediate hid stays in VMEM/registers; MXU dots for the H/2H contractions.
# ----------------------------------------------------------------------------
def _head_kernel(feat_ref, samp_ref, w1_ref, b1_ref, w2_ref, b2_ref, o_ref):
    x = jnp.concatenate([feat_ref[...], samp_ref[...]],
                        axis=0).astype(jnp.float32)              # (2H, tm)
    hid = jnp.dot(w1_ref[...], x, preferred_element_type=jnp.float32)
    hid = jnp.maximum(hid + b1_ref[...], 0.0)                    # (H, tm)
    out = jnp.dot(w2_ref[...], hid, preferred_element_type=jnp.float32)
    o_ref[...] = (out + b2_ref[...]).astype(o_ref.dtype)         # (oc, tm)


def fused_head(feat_t, samp_t, w1_t, b1_t, w2_t, b2_t, block_m):
    h, n_p = feat_t.shape
    oc = w2_t.shape[0]
    return pl.pallas_call(
        _head_kernel,
        out_shape=jax.ShapeDtypeStruct((oc, n_p), jnp.float32),
        grid_spec=pltpu.PrefetchScalarGridSpec(
            num_scalar_prefetch=0,
            grid=(n_p // block_m,),
            in_specs=[
                pl.BlockSpec((h, block_m), lambda i: (0, i)),
                pl.BlockSpec((h, block_m), lambda i: (0, i)),
                pl.BlockSpec((h, 2 * h), lambda i: (0, 0)),
                pl.BlockSpec((h, 1), lambda i: (0, 0)),
                pl.BlockSpec((oc, h), lambda i: (0, 0)),
                pl.BlockSpec((oc, 1), lambda i: (0, 0)),
            ],
            out_specs=pl.BlockSpec((oc, block_m), lambda i: (0, i)),
        ),
        compiler_params=pltpu.CompilerParams(
            dimension_semantics=("parallel",)),
    )(feat_t, samp_t, w1_t, b1_t, w2_t, b2_t)


# ----------------------------------------------------------------------------
# Plain-JAX glue: voxelization (scatter-mean) and voxel index math.
# ----------------------------------------------------------------------------
def voxel_indices(coords, grid_shape, aabb_min, aabb_max):
    g = jnp.array(grid_shape, jnp.float32)
    scale = g / (aabb_max - aabb_min)
    idx = jnp.floor((coords - aabb_min) * scale).astype(jnp.int32)
    idx = jnp.clip(idx, 0, jnp.array(grid_shape, jnp.int32) - 1)
    gx, gy, gz = grid_shape
    return idx[:, 0] * (gy * gz) + idx[:, 1] * gz + idx[:, 2]


def voxelize_mean(flat_idx, feats, num_voxels):
    # TODO(synk): data-dependent scatter-mean has no clean Pallas equivalent on TPU;
    # done with segment_sum in plain JAX.
    summed = jax.ops.segment_sum(feats, flat_idx, num_segments=num_voxels)
    counts = jax.ops.segment_sum(
        jnp.ones((feats.shape[0], 1), feats.dtype), flat_idx,
        num_segments=num_voxels)
    return summed / jnp.maximum(counts, 1.0)


# ----------------------------------------------------------------------------
# Model config / params / forward
# ----------------------------------------------------------------------------
class FIGConvConfig:
    def __init__(self):
        self.aabb_min = jnp.array([-1.0, -1.0, -1.0], jnp.float32)
        self.aabb_max = jnp.array([1.0, 1.0, 1.0], jnp.float32)
        self.scale = 8.0      # full grid 16 x 16 x 16
        self.scale2 = 4.0     # compressed x axis -> 8
        self.hidden_dim = 16
        self.out_channels = 1
        self.kernel_size = 5
        ext = self.aabb_max - self.aabb_min
        self.grid = (int(ext[0] * self.scale),
                     int(ext[1] * self.scale),
                     int(ext[2] * self.scale))                 # (16, 16, 16)
        self.p_shape_x = int(ext[0] * self.scale2)             # 8
        # factorized b_xc_y_z grid resolution: [p_shape_x, grid_y, grid_z]
        self.fac_grid = (self.p_shape_x, self.grid[1], self.grid[2])
        # per-point tile (lane axis of the transposed layout); identical across
        # v5e/v6e/v7x (per-point VMEM at H=16 is tiny everywhere; bigger = better).
        self.tm = 512


def init_params(cfg, key):
    keys = jax.random.split(key, 5)
    h = cfg.hidden_dim
    xc = cfg.p_shape_x * h
    kk = cfg.kernel_size * cfg.kernel_size
    oc = cfg.out_channels

    def w(k, shape, fan_in):
        return (jax.random.normal(k, shape, jnp.float32)
                / jnp.sqrt(jnp.float32(fan_in)))

    return {
        "w_enc":  w(keys[0], (3, h), 3),
        "b_enc":  jnp.zeros((1, h), jnp.float32),
        "w_conv": w(keys[1], (kk, xc, xc), kk * xc),
        "b_conv": jnp.zeros((1, xc), jnp.float32),
        "w_h1a":  w(keys[2], (h, h), 2 * h),
        "w_h1b":  w(keys[3], (h, h), 2 * h),
        "b_h1":   jnp.zeros((1, h), jnp.float32),
        "w_h2":   w(keys[4], (h, oc), h),
        "b_h2":   jnp.zeros((1, oc), jnp.float32),
    }


def figconv_forward(x, params, cfg):
    """x: [N, 3] point cloud -> sol_pred: [N, out_channels]."""
    n = x.shape[0]
    h = cfg.hidden_dim
    px, gy, gz = cfg.fac_grid
    xc = px * h

    block_m = min(cfg.tm, _round_up(n, 128))
    n_p = _round_up(n, block_m)

    # transposed point layout: channels on sublanes, points on lanes (lane-dense I/O)
    x_t = jnp.pad(x.astype(jnp.float32).T, ((0, 0), (0, n_p - n)))      # (3, Np)

    # 1) point encoder (Pallas, 'parallel' point tiles, bf16 feature output)
    feat_t = encoder_linear(x_t, params["w_enc"].T, params["b_enc"].T,
                            block_m)                                    # (H, Np) bf16

    # 2) point -> factorized grid, mean reduction (plain-JAX scatter).
    #    Only the real [:n] points enter the scatter (padded columns are excluded).
    flat_idx = voxel_indices(x, cfg.fac_grid, cfg.aabb_min, cfg.aabb_max)     # [N]
    feat_pts = feat_t[:, :n].astype(jnp.float32).T                            # [N, H] f32
    grid_feat = voxelize_mean(flat_idx, feat_pts, px * gy * gz)               # [PX*GY*GZ, H]
    fac = (grid_feat.reshape(px, gy, gz, h)
           .transpose(1, 2, 0, 3).reshape(gy, gz, xc))                        # [GY, GZ, X*C]

    # 3) factorized grid conv (Pallas: streamed weights, Y-tiled, K-fused, bf16)
    conv = factorized_conv(fac, params["w_conv"], params["b_conv"],
                           cfg.kernel_size)                                   # [GY, GZ, X*C] bf16

    # 4) grid -> point nearest-voxel gather (plain JAX)
    # TODO(synk): could fuse this gather into the head kernel (the conv table is only
    # px*gy*gz*H bf16 and fits in VMEM); kept as an XLA gather for robustness.
    conv_flat = (conv.reshape(gy, gz, px, h)
                 .transpose(2, 0, 1, 3).reshape(px * gy * gz, h))             # [V, H] bf16
    flat_idx_p = jnp.pad(flat_idx, ((0, n_p - n),))
    sampled_t = jnp.take(conv_flat, flat_idx_p, axis=0).T                     # [H, Np] bf16

    # 5) fused per-point head (Pallas): no concat array, no [N, H] round-trip
    w1_t = jnp.concatenate([params["w_h1a"].T, params["w_h1b"].T], axis=1)    # (H, 2H)
    out_t = fused_head(feat_t, sampled_t, w1_t, params["b_h1"].T,
                       params["w_h2"].T, params["b_h2"].T, block_m)           # (oc, Np)
    return out_t[:, :n].T


# ----------------------------------------------------------------------------
# Pure-JAX reference of the same math (kernel-vs-XLA correctness check, all f32)
# ----------------------------------------------------------------------------
def _reference_forward(x, params, cfg):
    h = cfg.hidden_dim
    px, gy, gz = cfg.fac_grid
    xc = px * h
    ks = cfg.kernel_size

    feat = jnp.maximum(x @ params["w_enc"] + params["b_enc"], 0.0)
    flat_idx = voxel_indices(x, cfg.fac_grid, cfg.aabb_min, cfg.aabb_max)
    grid_feat = voxelize_mean(flat_idx, feat, px * gy * gz)
    fac = (grid_feat.reshape(px, gy, gz, h)
           .transpose(1, 2, 0, 3).reshape(gy, gz, xc))

    pad = ks // 2
    gp = jnp.pad(fac, ((pad, pad), (pad, pad), (0, 0)))
    acc = jnp.zeros((gy * gz, xc), jnp.float32)
    for di in range(ks):
        for dj in range(ks):
            tap = di * ks + dj
            acc = acc + (gp[di:di + gy, dj:dj + gz, :].reshape(gy * gz, xc)
                         @ params["w_conv"][tap])
    conv = jnp.maximum(acc + params["b_conv"], 0.0).reshape(gy, gz, xc)

    conv_flat = (conv.reshape(gy, gz, px, h)
                 .transpose(2, 0, 1, 3).reshape(px * gy * gz, h))
    sampled = conv_flat[flat_idx]
    hid = jnp.maximum(feat @ params["w_h1a"] + sampled @ params["w_h1b"]
                      + params["b_h1"], 0.0)
    return hid @ params["w_h2"] + params["b_h2"]


# ----------------------------------------------------------------------------
if __name__ == "__main__":
    cfg = FIGConvConfig()
    key = jax.random.PRNGKey(0)
    kp, kx = jax.random.split(key)
    params = init_params(cfg, kp)

    # graph.x : N points inside the AABB
    N = 1000
    x = jax.random.uniform(kx, (N, 3), jnp.float32, minval=-1.0, maxval=1.0)

    fwd = jax.jit(lambda pts: figconv_forward(pts, params, cfg))
    sol_pred = jax.block_until_ready(fwd(x))

    assert sol_pred.shape == (N, cfg.out_channels), sol_pred.shape
    assert bool(jnp.all(jnp.isfinite(sol_pred)))

    ref = _reference_forward(x, params, cfg)
    err = float(jnp.max(jnp.abs(sol_pred - ref)))
    assert err < 5e-2, f"max abs err vs plain-JAX reference: {err}"

    print("KERNEL_OK")
</pallas_src>

<mosaic_0001>
module attributes {stable_mosaic.version = 11 : i64} {
  func.func @_encoder_kernel(%arg0: i32, %arg1: memref<3x512xf32, #tpu.memory_space<vmem>>, %arg2: memref<16x3xf32, #tpu.memory_space<vmem>>, %arg3: memref<16x1xf32, #tpu.memory_space<vmem>>, %arg4: memref<16x512xbf16, #tpu.memory_space<vmem>>) attributes {dimension_semantics = [#tpu.dimension_semantics<parallel>], iteration_bounds = array<i64: 2>, scalar_prefetch = 0 : i64, scratch_operands = 0 : i64, tpu.core_type = #tpu.core_type<tc>, window_params = [{transform_indices = @transform_0, window_bounds = array<i64: 3, 512>}, {pipeline_mode = #tpu.pipeline_mode<synchronous>, transform_indices = @transform_1, window_bounds = array<i64: 16, 3>}, {pipeline_mode = #tpu.pipeline_mode<synchronous>, transform_indices = @transform_2, window_bounds = array<i64: 16, 1>}, {transform_indices = @transform_3, window_bounds = array<i64: 16, 512>}]} {
    %c0 = arith.constant 0 : index
    %c0_0 = arith.constant 0 : index
    %0 = vector.load %arg1[%c0, %c0_0] : memref<3x512xf32, #tpu.memory_space<vmem>>, vector<3x512xf32>
    %c0_1 = arith.constant 0 : index
    %c0_2 = arith.constant 0 : index
    %1 = vector.load %arg2[%c0_1, %c0_2] : memref<16x3xf32, #tpu.memory_space<vmem>>, vector<16x3xf32>
    %c0_3 = arith.constant 0 : index
    %c0_4 = arith.constant 0 : index
    %2 = vector.load %arg3[%c0_3, %c0_4] : memref<16x1xf32, #tpu.memory_space<vmem>>, vector<16x1xf32>
    %3 = vector.extract_strided_slice %1 {offsets = [0, 0], sizes = [16, 1], strides = [1, 1]} : vector<16x3xf32> to vector<16x1xf32>
    %4 = vector.extract_strided_slice %0 {offsets = [0, 0], sizes = [1, 512], strides = [1, 1]} : vector<3x512xf32> to vector<1x512xf32>
    %5 = vector.broadcast %3 : vector<16x1xf32> to vector<16x512xf32>
    %6 = vector.broadcast %4 : vector<1x512xf32> to vector<16x512xf32>
    %7 = arith.mulf %5, %6 : vector<16x512xf32>
    %8 = vector.broadcast %2 : vector<16x1xf32> to vector<16x512xf32>
    %9 = arith.addf %8, %7 : vector<16x512xf32>
    %10 = vector.extract_strided_slice %1 {offsets = [0, 1], sizes = [16, 1], strides = [1, 1]} : vector<16x3xf32> to vector<16x1xf32>
    %11 = vector.extract_strided_slice %0 {offsets = [1, 0], sizes = [1, 512], strides = [1, 1]} : vector<3x512xf32> to vector<1x512xf32>
    %12 = vector.broadcast %10 : vector<16x1xf32> to vector<16x512xf32>
    %13 = vector.broadcast %11 : vector<1x512xf32> to vector<16x512xf32>
    %14 = arith.mulf %12, %13 : vector<16x512xf32>
    %15 = arith.addf %9, %14 : vector<16x512xf32>
    %16 = vector.extract_strided_slice %1 {offsets = [0, 2], sizes = [16, 1], strides = [1, 1]} : vector<16x3xf32> to vector<16x1xf32>
    %17 = vector.extract_strided_slice %0 {offsets = [2, 0], sizes = [1, 512], strides = [1, 1]} : vector<3x512xf32> to vector<1x512xf32>
    %18 = vector.broadcast %16 : vector<16x1xf32> to vector<16x512xf32>
    %19 = vector.broadcast %17 : vector<1x512xf32> to vector<16x512xf32>
    %20 = arith.mulf %18, %19 : vector<16x512xf32>
    %21 = arith.addf %15, %20 : vector<16x512xf32>
    %cst = arith.constant 0.000000e+00 : f32
    %22 = vector.broadcast %cst : f32 to vector<16x512xf32>
    %23 = arith.maximumf %21, %22 : vector<16x512xf32>
    %24 = arith.truncf %23 : vector<16x512xf32> to vector<16x512xbf16>
    %c0_5 = arith.constant 0 : index
    %c0_6 = arith.constant 0 : index
    %25 = vector.load %arg4[%c0_5, %c0_6] : memref<16x512xbf16, #tpu.memory_space<vmem>>, vector<16x512xbf16>
    tpu.vector_store %arg4[%c0_5, %c0_6], %24 {strides = array<i32>} : memref<16x512xbf16, #tpu.memory_space<vmem>>, vector<16x512xbf16>,
    return
  }
  func.func @transform_0(%arg0: i32) -> (i32, i32) {
    %c0_i32 = arith.constant 0 : i32
    %c0_i32_0 = arith.constant 0 : i32
    return %c0_i32, %arg0 : i32, i32
  }
  func.func @transform_1(%arg0: i32) -> (i32, i32) {
    %c0_i32 = arith.constant 0 : i32
    %c0_i32_0 = arith.constant 0 : i32
    %c0_i32_1 = arith.constant 0 : i32
    return %c0_i32, %c0_i32_0 : i32, i32
  }
  func.func @transform_2(%arg0: i32) -> (i32, i32) {
    %c0_i32 = arith.constant 0 : i32
    %c0_i32_0 = arith.constant 0 : i32
    %c0_i32_1 = arith.constant 0 : i32
    return %c0_i32, %c0_i32_0 : i32, i32
  }
  func.func @transform_3(%arg0: i32) -> (i32, i32) {
    %c0_i32 = arith.constant 0 : i32
    %c0_i32_0 = arith.constant 0 : i32
    return %c0_i32, %arg0 : i32, i32
  }
}

module attributes {stable_mosaic.version = 11 : i64} {
  func.func @_conv_kernel(%arg0: i32, %arg1: i32, %arg2: memref<20x20x128xbf16, #tpu.memory_space<vmem>>, %arg3: memref<1x640x128xbf16, #tpu.memory_space<vmem>>, %arg4: memref<1x128xf32, #tpu.memory_space<vmem>>, %arg5: memref<8x16x128xbf16, #tpu.memory_space<vmem>>, %arg6: memref<128x128xf32, #tpu.memory_space<vmem>>, %arg7: memref<12x16x640xbf16, #tpu.memory_space<vmem>>) attributes {dimension_semantics = [#tpu.dimension_semantics<parallel>, #tpu.dimension_semantics<arbitrary>], iteration_bounds = array<i64: 2, 5>, scalar_prefetch = 0 : i64, scratch_operands = 2 : i64, tpu.core_type = #tpu.core_type<tc>, window_params = [{pipeline_mode = #tpu.pipeline_mode<synchronous>, transform_indices = @transform_0, window_bounds = array<i64: 20, 20, 128>}, {transform_indices = @transform_1, window_bounds = array<i64: 1, 640, 128>}, {pipeline_mode = #tpu.pipeline_mode<synchronous>, transform_indices = @transform_2, window_bounds = array<i64: 1, 128>}, {transform_indices = @transform_3, window_bounds = array<i64: 8, 16, 128>}]} {
    %c8_i32 = arith.constant 8 : i32
    %0 = arith.muli %arg0, %c8_i32 : i32
    %c0_i32 = arith.constant 0 : i32
    %1 = arith.cmpi eq, %arg1, %c0_i32 : i32
    %2 = arith.extui %1 : i1 to i32
    %c0_i32_0 = arith.constant 0 : i32
    %3 = arith.cmpi ne, %2, %c0_i32_0 : i32
    scf.if %3 {
      %cst_10 = arith.constant 0.000000e+00 : f32
      %16 = vector.broadcast %cst_10 : f32 to vector<128x128xf32>
      %c0_11 = arith.constant 0 : index
      %c0_12 = arith.constant 0 : index
      %17 = vector.load %arg6[%c0_11, %c0_12] : memref<128x128xf32, #tpu.memory_space<vmem>>, vector<128x128xf32>
      tpu.vector_store %arg6[%c0_11, %c0_12], %16 {strides = array<i32>} : memref<128x128xf32, #tpu.memory_space<vmem>>, vector<128x128xf32>,
      %18 = arith.index_cast %0 : i32 to index
      %c0_13 = arith.constant 0 : index
      %c0_14 = arith.constant 0 : index
      %19 = vector.load %arg2[%18, %c0_13, %c0_14] : memref<20x20x128xbf16, #tpu.memory_space<vmem>>, vector<12x20x128xbf16>
      %20 = vector.extract_strided_slice %19 {offsets = [0, 0, 0], sizes = [12, 16, 128], strides = [1, 1, 1]} : vector<12x20x128xbf16> to vector<12x16x128xbf16>
      %c0_15 = arith.constant 0 : index
      %c0_16 = arith.constant 0 : index
      %c0_17 = arith.constant 0 : index
      %21 = vector.load %arg7[%c0_15, %c0_16, %c0_17] : memref<12x16x640xbf16, #tpu.memory_space<vmem>>, vector<12x16x128xbf16>
      tpu.vector_store %arg7[%c0_15, %c0_16, %c0_17], %20 {strides = array<i32>} : memref<12x16x640xbf16, #tpu.memory_space<vmem>>, vector<12x16x128xbf16>,
      %22 = vector.extract_strided_slice %19 {offsets = [0, 1, 0], sizes = [12, 16, 128], strides = [1, 1, 1]} : vector<12x20x128xbf16> to vector<12x16x128xbf16>
      %c0_18 = arith.constant 0 : index
      %c0_19 = arith.constant 0 : index
      %c128 = arith.constant 128 : index
      %23 = vector.load %arg7[%c0_18, %c0_19, %c128] : memref<12x16x640xbf16, #tpu.memory_space<vmem>>, vector<12x16x128xbf16>
      tpu.vector_store %arg7[%c0_18, %c0_19, %c128], %22 {strides = array<i32>} : memref<12x16x640xbf16, #tpu.memory_space<vmem>>, vector<12x16x128xbf16>,
      %24 = vector.extract_strided_slice %19 {offsets = [0, 2, 0], sizes = [12, 16, 128], strides = [1, 1, 1]} : vector<12x20x128xbf16> to vector<12x16x128xbf16>
      %c0_20 = arith.constant 0 : index
      %c0_21 = arith.constant 0 : index
      %c256 = arith.constant 256 : index
      %25 = vector.load %arg7[%c0_20, %c0_21, %c256] : memref<12x16x640xbf16, #tpu.memory_space<vmem>>, vector<12x16x128xbf16>
      tpu.vector_store %arg7[%c0_20, %c0_21, %c256], %24 {strides = array<i32>} : memref<12x16x640xbf16, #tpu.memory_space<vmem>>, vector<12x16x128xbf16>,
      %26 = vector.extract_strided_slice %19 {offsets = [0, 3, 0], sizes = [12, 16, 128], strides = [1, 1, 1]} : vector<12x20x128xbf16> to vector<12x16x128xbf16>
      %c0_22 = arith.constant 0 : index
      %c0_23 = arith.constant 0 : index
      %c384 = arith.constant 384 : index
      %27 = vector.load %arg7[%c0_22, %c0_23, %c384] : memref<12x16x640xbf16, #tpu.memory_space<vmem>>, vector<12x16x128xbf16>
      tpu.vector_store %arg7[%c0_22, %c0_23, %c384], %26 {strides = array<i32>} : memref<12x16x640xbf16, #tpu.memory_space<vmem>>, vector<12x16x128xbf16>,
      %28 = vector.extract_strided_slice %19 {offsets = [0, 4, 0], sizes = [12, 16, 128], strides = [1, 1, 1]} : vector<12x20x128xbf16> to vector<12x16x128xbf16>
      %c0_24 = arith.constant 0 : index
      %c0_25 = arith.constant 0 : index
      %c512 = arith.constant 512 : index
      %29 = vector.load %arg7[%c0_24, %c0_25, %c512] : memref<12x16x640xbf16, #tpu.memory_space<vmem>>, vector<12x16x128xbf16>
      tpu.vector_store %arg7[%c0_24, %c0_25, %c512], %28 {strides = array<i32>} : memref<12x16x640xbf16, #tpu.memory_space<vmem>>, vector<12x16x128xbf16>,
    } else {
    }
    %4 = arith.index_cast %arg1 : i32 to index
    %c0 = arith.constant 0 : index
    %c0_1 = arith.constant 0 : index
    %5 = vector.load %arg7[%4, %c0, %c0_1] : memref<12x16x640xbf16, #tpu.memory_space<vmem>>, vector<8x16x640xbf16>
    %6 = vector.shape_cast %5 : vector<8x16x640xbf16> to vector<128x640xbf16>
    %c0_2 = arith.constant 0 : index
    %c0_3 = arith.constant 0 : index
    %7 = vector.load %arg6[%c0_2, %c0_3] : memref<128x128xf32, #tpu.memory_space<vmem>>, vector<128x128xf32>
    %c0_4 = arith.constant 0 : index
    %c0_5 = arith.constant 0 : index
    %c0_6 = arith.constant 0 : index
    %8 = vector.load %arg3[%c0_4, %c0_5, %c0_6] : memref<1x640x128xbf16, #tpu.memory_space<vmem>>, vector<1x640x128xbf16>
    %9 = vector.shape_cast %8 : vector<1x640x128xbf16> to vector<640x128xbf16>
    %cst = arith.constant dense<0.000000e+00> : vector<128x128xf32>
    %10 = tpu.matmul %6, %9, %cst {dimension_numbers = #tpu.dot_dimension_numbers<[1], [0], [0], [1], [0, 0, 1, 1], [], []>} : vector<128x640xbf16>, vector<640x128xbf16>, vector<128x128xf32> -> vector<128x128xf32>
    %11 = arith.addf %7, %10 : vector<128x128xf32>
    %c0_7 = arith.constant 0 : index
    %c0_8 = arith.constant 0 : index
    %12 = vector.load %arg6[%c0_7, %c0_8] : memref<128x128xf32, #tpu.memory_space<vmem>>, vector<128x128xf32>
    tpu.vector_store %arg6[%c0_7, %c0_8], %11 {strides = array<i32>} : memref<128x128xf32, #tpu.memory_space<vmem>>, vector<128x128xf32>,
    %c4_i32 = arith.constant 4 : i32
    %13 = arith.cmpi eq, %arg1, %c4_i32 : i32
    %14 = arith.extui %13 : i1 to i32
    %c0_i32_9 = arith.constant 0 : i32
    %15 = arith.cmpi ne, %14, %c0_i32_9 : i32
    scf.if %15 {
      %c0_10 = arith.constant 0 : index
      %c0_11 = arith.constant 0 : index
      %16 = vector.load %arg6[%c0_10, %c0_11] : memref<128x128xf32, #tpu.memory_space<vmem>>, vector<128x128xf32>
      %c0_12 = arith.constant 0 : index
      %c0_13 = arith.constant 0 : index
      %17 = vector.load %arg4[%c0_12, %c0_13] : memref<1x128xf32, #tpu.memory_space<vmem>>, vector<1x128xf32>
      %18 = vector.broadcast %17 : vector<1x128xf32> to vector<128x128xf32>
      %19 = arith.addf %16, %18 : vector<128x128xf32>
      %cst_14 = arith.constant 0.000000e+00 : f32
      %20 = vector.broadcast %cst_14 : f32 to vector<128x128xf32>
      %21 = arith.maximumf %19, %20 : vector<128x128xf32>
      %22 = vector.shape_cast %21 : vector<128x128xf32> to vector<8x16x128xf32>
      %23 = arith.truncf %22 : vector<8x16x128xf32> to vector<8x16x128xbf16>
      %c0_15 = arith.constant 0 : index
      %c0_16 = arith.constant 0 : index
      %c0_17 = arith.constant 0 : index
      %24 = vector.load %arg5[%c0_15, %c0_16, %c0_17] : memref<8x16x128xbf16, #tpu.memory_space<vmem>>, vector<8x16x128xbf16>
      tpu.vector_store %arg5[%c0_15, %c0_16, %c0_17], %23 {strides = array<i32>} : memref<8x16x128xbf16, #tpu.memory_space<vmem>>, vector<8x16x128xbf16>,
    } else {
    }
    return
  }
  func.func @transform_0(%arg0: i32, %arg1: i32) -> (i32, i32, i32) {
    %c0_i32 = arith.constant 0 : i32
    %c0_i32_0 = arith.constant 0 : i32
    %c0_i32_1 = arith.constant 0 : i32
    %c0_i32_2 = arith.constant 0 : i32
    return %c0_i32, %c0_i32_0, %c0_i32_1 : i32, i32, i32
  }
  func.func @transform_1(%arg0: i32, %arg1: i32) -> (i32, i32, i32) {
    %c0_i32 = arith.constant 0 : i32
    %c0_i32_0 = arith.constant 0 : i32
    %c0_i32_1 = arith.constant 0 : i32
    return %arg1, %c0_i32, %c0_i32_0 : i32, i32, i32
  }
  func.func @transform_2(%arg0: i32, %arg1: i32) -> (i32, i32) {
    %c0_i32 = arith.constant 0 : i32
    %c0_i32_0 = arith.constant 0 : i32
    %c0_i32_1 = arith.constant 0 : i32
    return %c0_i32, %c0_i32_0 : i32, i32
  }
  func.func @transform_3(%arg0: i32, %arg1: i32) -> (i32, i32, i32) {
    %c0_i32 = arith.constant 0 : i32
    %c0_i32_0 = arith.constant 0 : i32
    %c0_i32_1 = arith.constant 0 : i32
    return %arg0, %c0_i32, %c0_i32_0 : i32, i32, i32
  }
}

module attributes {stable_mosaic.version = 11 : i64} {
  func.func @_head_kernel(%arg0: i32, %arg1: memref<16x512xbf16, #tpu.memory_space<vmem>>, %arg2: memref<16x512xbf16, #tpu.memory_space<vmem>>, %arg3: memref<16x32xf32, #tpu.memory_space<vmem>>, %arg4: memref<16x1xf32, #tpu.memory_space<vmem>>, %arg5: memref<1x16xf32, #tpu.memory_space<vmem>>, %arg6: memref<1x1xf32, #tpu.memory_space<vmem>>, %arg7: memref<1x512xf32, #tpu.memory_space<vmem>>) attributes {dimension_semantics = [#tpu.dimension_semantics<parallel>], iteration_bounds = array<i64: 2>, scalar_prefetch = 0 : i64, scratch_operands = 0 : i64, tpu.core_type = #tpu.core_type<tc>, window_params = [{transform_indices = @transform_0, window_bounds = array<i64: 16, 512>}, {transform_indices = @transform_1, window_bounds = array<i64: 16, 512>}, {pipeline_mode = #tpu.pipeline_mode<synchronous>, transform_indices = @transform_2, window_bounds = array<i64: 16, 32>}, {pipeline_mode = #tpu.pipeline_mode<synchronous>, transform_indices = @transform_3, window_bounds = array<i64: 16, 1>}, {pipeline_mode = #tpu.pipeline_mode<synchronous>, transform_indices = @transform_4, window_bounds = array<i64: 1, 16>}, {pipeline_mode = #tpu.pipeline_mode<synchronous>, transform_indices = @transform_5, window_bounds = array<i64: 1, 1>}, {transform_indices = @transform_6, window_bounds = array<i64: 1, 512>}]} {
    %c0 = arith.constant 0 : index
    %c0_0 = arith.constant 0 : index
    %0 = vector.load %arg1[%c0, %c0_0] : memref<16x512xbf16, #tpu.memory_space<vmem>>, vector<16x512xbf16>
    %c0_1 = arith.constant 0 : index
    %c0_2 = arith.constant 0 : index
    %1 = vector.load %arg2[%c0_1, %c0_2] : memref<16x512xbf16, #tpu.memory_space<vmem>>, vector<16x512xbf16>
    %2 = tpu.concatenate %0, %1 in 0 : vector<16x512xbf16>, vector<16x512xbf16> -> vector<32x512xbf16>
    %3 = arith.extf %2 : vector<32x512xbf16> to vector<32x512xf32>
    %c0_3 = arith.constant 0 : index
    %c0_4 = arith.constant 0 : index
    %4 = vector.load %arg3[%c0_3, %c0_4] : memref<16x32xf32, #tpu.memory_space<vmem>>, vector<16x32xf32>
    %cst = arith.constant dense<0.000000e+00> : vector<16x512xf32>
    %5 = tpu.matmul %4, %3, %cst {dimension_numbers = #tpu.dot_dimension_numbers<[1], [0], [0], [1], [0, 0, 1, 1], [], []>} : vector<16x32xf32>, vector<32x512xf32>, vector<16x512xf32> -> vector<16x512xf32>
    %c0_5 = arith.constant 0 : index
    %c0_6 = arith.constant 0 : index
    %6 = vector.load %arg4[%c0_5, %c0_6] : memref<16x1xf32, #tpu.memory_space<vmem>>, vector<16x1xf32>
    %7 = vector.broadcast %6 : vector<16x1xf32> to vector<16x512xf32>
    %8 = arith.addf %5, %7 : vector<16x512xf32>
    %cst_7 = arith.constant 0.000000e+00 : f32
    %9 = vector.broadcast %cst_7 : f32 to vector<16x512xf32>
    %10 = arith.maximumf %8, %9 : vector<16x512xf32>
    %c0_8 = arith.constant 0 : index
    %c0_9 = arith.constant 0 : index
    %11 = vector.load %arg5[%c0_8, %c0_9] : memref<1x16xf32, #tpu.memory_space<vmem>>, vector<1x16xf32>
    %cst_10 = arith.constant dense<0.000000e+00> : vector<1x512xf32>
    %12 = tpu.matmul %11, %10, %cst_10 {dimension_numbers = #tpu.dot_dimension_numbers<[1], [0], [0], [1], [0, 0, 1, 1], [], []>} : vector<1x16xf32>, vector<16x512xf32>, vector<1x512xf32> -> vector<1x512xf32>
    %c0_11 = arith.constant 0 : index
    %c0_12 = arith.constant 0 : index
    %13 = vector.load %arg6[%c0_11, %c0_12] : memref<1x1xf32, #tpu.memory_space<vmem>>, vector<1x1xf32>
    %14 = vector.broadcast %13 : vector<1x1xf32> to vector<1x512xf32>
    %15 = arith.addf %12, %14 : vector<1x512xf32>
    %c0_13 = arith.constant 0 : index
    %c0_14 = arith.constant 0 : index
    %16 = vector.load %arg7[%c0_13, %c0_14] : memref<1x512xf32, #tpu.memory_space<vmem>>, vector<1x512xf32>
    tpu.vector_store %arg7[%c0_13, %c0_14], %15 {strides = array<i32>} : memref<1x512xf32, #tpu.memory_space<vmem>>, vector<1x512xf32>,
    return
  }
  func.func @transform_0(%arg0: i32) -> (i32, i32) {
    %c0_i32 = arith.constant 0 : i32
    %c0_i32_0 = arith.constant 0 : i32
    return %c0_i32, %arg0 : i32, i32
  }
  func.func @transform_1(%arg0: i32) -> (i32, i32) {
    %c0_i32 = arith.constant 0 : i32
    %c0_i32_0 = arith.constant 0 : i32
    return %c0_i32, %arg0 : i32, i32
  }
  func.func @transform_2(%arg0: i32) -> (i32, i32) {
    %c0_i32 = arith.constant 0 : i32
    %c0_i32_0 = arith.constant 0 : i32
    %c0_i32_1 = arith.constant 0 : i32
    return %c0_i32, %c0_i32_0 : i32, i32
  }
  func.func @transform_3(%arg0: i32) -> (i32, i32) {
    %c0_i32 = arith.constant 0 : i32
    %c0_i32_0 = arith.constant 0 : i32
    %c0_i32_1 = arith.constant 0 : i32
    return %c0_i32, %c0_i32_0 : i32, i32
  }
  func.func @transform_4(%arg0: i32) -> (i32, i32) {
    %c0_i32 = arith.constant 0 : i32
    %c0_i32_0 = arith.constant 0 : i32
    %c0_i32_1 = arith.constant 0 : i32
    return %c0_i32, %c0_i32_0 : i32, i32
  }
  func.func @transform_5(%arg0: i32) -> (i32, i32) {
    %c0_i32 = arith.constant 0 : i32
    %c0_i32_0 = arith.constant 0 : i32
    %c0_i32_1 = arith.constant 0 : i32
    return %c0_i32, %c0_i32_0 : i32, i32
  }
  func.func @transform_6(%arg0: i32) -> (i32, i32) {
    %c0_i32 = arith.constant 0 : i32
    %c0_i32_0 = arith.constant 0 : i32
    return %c0_i32, %arg0 : i32, i32
  }
}

</mosaic_0001>

<bundles_post_ra>
// kernel: _lambda_.3
= control target key start
LH: loop header
LB: loop body
LE: loop exit
PB: predicated region body
PF: predicated region fallthrough
CT: control target
= control target key end

     0   :  { %s488_s12 = smov 0   ;;  %s490_s13 = smov 0   ;;  %s550_s0 = inlined_call_operand.vmem [shape: f32[3,1024], index: 0, kind: input, shape index: {}]   ;;  %s551_s1 = inlined_call_operand.vmem [shape: f32[16,3], index: 1, kind: input, shape index: {}]   ;;  %s552_s2 = inlined_call_operand.vmem [shape: f32[16,1], index: 2, kind: input, shape index: {}]   ;;  %s553_s3 = inlined_call_operand.vmem [shape: bf16[16,1024], index: 3, kind: output, shape index: {}]  }
   0x1   :  { %s492_s14 = smov 0  }
   0x2 LB: > { %s501_s15 = sadd.s32 4294967295, %s463_s14   ;;  %s503_s16 = sadd.s32 1, %s463_s14   ;;  %s463_s14 = sphi %s492_s14, %s557_s14   ;;  %s459_s13 = sphi %s490_s13, %s556_s13   ;;  %s455_s12 = sphi %s488_s12, %s555_s12  }
   0x3   : > { %s85_s17 = ssub.s32 %s463_s14, %s503_s16  ;;  %s88_s18 = sadd.s32 1, %s459_s13 }
   0x4   : > { %p86_p0 = scmp.eq.s32.totalorder %s85_s17, 0  ;;  %p98_p1 = scmp.ne.s32.totalorder %s459_s13, %s455_s12 }
   0x5   : > { %p99_p2 = scmp.eq.s32.totalorder %s501_s15, 1  ;;  %p399_p3 = scmp.ge.s32.totalorder %s463_s14, 1 }
   0x6   : > { %s511_s19 = scalar_select %p86_p0, %s459_s13, %s88_s18  }
   0x7   : > { %p513_p4 = por %p99_p2, %p98_p1  ;;  %p138_p5 = scmp.lt.s32.totalorder %s463_s14, 3 }
   0x9   : > { %p139_p6 = pnand %p399_p3, %p138_p5 }
   0xa   : > { %s401_s29 = sshll.u32 (!%p139_p6), %s501_s15, 2  ;;  %s158_s7 = sand.u32 (!%p139_p6), 1, %s455_s12  }
   0xb   : > { %142 = sbr.rel (%p139_p6) target bundleno = 170 (0xaa), region = 32  ;;  %p162_p7 = scmp.lt.s32.totalorder (!%p139_p6), %s401_s29, 7 }
   0xc   : > { %s400_s8 = sshll.u32 (!%p139_p6), %s158_s7, 5 }
   0xd   : > { %s160_s9 = scalar_lea.vmem (!%p139_p6), [#allocation2], %s400_s8 }
  0x10   : > { %v172_v0 = vld [vmem:[%s552_s2] sm:$0xff]  ;;  %v465_v2 = vmov 0   ;;  %v466_v3 = vmov 1   ;;  %v173_v4 = vld [vmem:[%s552_s2 + $0x8] sm:$0xff]  ;;  %v467_v6 = vmov 2   ;;  %s559_s29 = smov (!%p162_p7, %s401_s29), 7 }
  0x11   : > { %v170_v1 = vld [vmem:[%s551_s1] sm:$0xff]  ;;  %437 = vset.pattern.permute.xlu1 %v465_v2  ;;  %436 = vset.pattern.permute.xlu0 %v465_v2  ;;  %v171_v5 = vld [vmem:[%s551_s1 + $0x8] sm:$0xff]  ;;  %s402_s30 = sshll.u32 %s559_s29, 2  ;;  %s408_s10 = sshll.u32 (%p513_p4), %s501_s15, 4 }
  0x12   : > { %208 = vperm.xlu1 %437, %v172_v0   ;;  %176 = vperm.xlu0 %436, %v170_v1   ;;  %s165_s6 = scalar_lea.vmem %s550_s0, %s402_s30  ;;  %s321_s14 = scalar_lea.vmem (%p513_p4), %s553_s3, %s408_s10 }
  0x13   : > { %438 = vset.pattern.permute.xlu2 %v466_v3  ;;  %v168_v7 = vld [vmem:[%s165_s6] sm:$0x77]  ;;  %v169_v8 = vld [vmem:[%s165_s6 + $0x8] sm:$0x77] }
  0x14   : > { %225 = vperm.xlu2 %438, %v170_v1   ;;  %v186_v11 = vperm.slane %v168_v7, 0  ;;  %v187_v12 = vperm.slane %v168_v7, 4  ;;  %v188_v13 = vperm.slane %v169_v8, 0  ;;  %v189_v14 = vperm.slane %v169_v8, 4 }
  0x15   : > { %v232_v16 = vperm.slane %v168_v7, 1  ;;  %v233_v17 = vperm.slane %v168_v7, 5  ;;  %v234_v18 = vperm.slane %v169_v8, 1  ;;  %v235_v19 = vperm.slane %v169_v8, 5 }
  0x16   : > { %v194_v20 = vperm.slane %v186_v11, 0  ;;  %v195_v21 = vperm.slane %v187_v12, 0  ;;  %v196_v22 = vperm.slane %v188_v13, 0  ;;  %v197_v23 = vperm.slane %v189_v14, 0 }
  0x17   : > { %v240_v24 = vperm.slane %v232_v16, 1  ;;  %v241_v25 = vperm.slane %v233_v17, 1  ;;  %v242_v26 = vperm.slane %v234_v18, 1  ;;  %v243_v27 = vperm.slane %v235_v19, 1 }
  0x18   : > { %v268_v38 = vperm.slane %v168_v7, 2  ;;  %v269_v39 = vperm.slane %v168_v7, 6  ;;  %v270_v40 = vperm.slane %v169_v8, 2  ;;  %v271_v41 = vperm.slane %v169_v8, 6 }
  0x1a   : > { %213 = vperm.xlu1 %437, %v173_v4   ;;  %181 = vperm.xlu0 %436, %v171_v5   ;;  %v276_v55 = vperm.slane %v268_v38, 2  ;;  %v277_v56 = vperm.slane %v269_v39, 2  ;;  %v278_v57 = vperm.slane %v270_v40, 2  ;;  %v279_v58 = vperm.slane %v271_v41, 2 }
  0x1c   : > { %229 = vperm.xlu2 %438, %v171_v5  }
  0x22   : > { %440 = vset.pattern.permute.xlu1 %v467_v6  ;;  %439 = vset.pattern.permute.xlu0 %v467_v6 }
  0x23   : > { %265 = vperm.xlu1 %440, %v171_v5   ;;  %261 = vperm.xlu0 %439, %v170_v1  }
  0x6e   : > { %v226_v15 = vpop.permute.xlu2 %225 }
  0x6f   : > { %v244_v42 = vmul.f32 %v240_v24, %v226_v15  ;;  %v245_v43 = vmul.f32 %v241_v25, %v226_v15  ;;  %v246_v44 = vmul.f32 %v242_v26, %v226_v15  ;;  %v247_v45 = vmul.f32 %v243_v27, %v226_v15 }
  0x76   : > { %v230_v50 = vpop.permute.xlu2 %229 }
  0x77   : > { %v248_v59 = vmul.f32 %v240_v24, %v230_v50  ;;  %v249_v60 = vmul.f32 %v241_v25, %v230_v50  ;;  %v250_v61 = vmul.f32 %v242_v26, %v230_v50  ;;  %v251_v62 = vmul.f32 %v243_v27, %v230_v50 }
  0x84   : > { %v209_v9 = vpop.permute.xlu1 %208  ;;  %v177_v10 = vpop.permute.xlu0 %176 }
  0x85   : > { %v198_v28 = vmul.f32 %v194_v20, %v177_v10  ;;  %v199_v29 = vmul.f32 %v195_v21, %v177_v10  ;;  %v200_v30 = vmul.f32 %v196_v22, %v177_v10  ;;  %v201_v31 = vmul.f32 %v197_v23, %v177_v10 }
  0x87   : > { %v216_v46 = vadd.f32 %v209_v9, %v198_v28  ;;  %v217_v47 = vadd.f32 %v209_v9, %v199_v29  ;;  %v218_v48 = vadd.f32 %v209_v9, %v200_v30  ;;  %v219_v49 = vadd.f32 %v209_v9, %v201_v31 }
  0x89   : > { %v252_v63 = vadd.f32 %v244_v42, %v216_v46  ;;  %v253_v0 = vadd.f32 %v245_v43, %v217_v47  ;;  %v254_v1 = vadd.f32 %v246_v44, %v218_v48  ;;  %v255_v2 = vadd.f32 %v247_v45, %v219_v49 }
  0x8c   : > { %v214_v32 = vpop.permute.xlu1 %213  ;;  %v182_v33 = vpop.permute.xlu0 %181 }
  0x8d   : > { %v202_v34 = vmul.f32 %v194_v20, %v182_v33  ;;  %v203_v35 = vmul.f32 %v195_v21, %v182_v33  ;;  %v204_v36 = vmul.f32 %v196_v22, %v182_v33  ;;  %v205_v37 = vmul.f32 %v197_v23, %v182_v33 }
  0x8f   : > { %v220_v51 = vadd.f32 %v214_v32, %v202_v34  ;;  %v221_v52 = vadd.f32 %v214_v32, %v203_v35  ;;  %v222_v53 = vadd.f32 %v214_v32, %v204_v36  ;;  %v223_v54 = vadd.f32 %v214_v32, %v205_v37 }
  0x91   : > { %v256_v4 = vadd.f32 %v248_v59, %v220_v51  ;;  %v257_v5 = vadd.f32 %v249_v60, %v221_v52  ;;  %v258_v6 = vadd.f32 %v250_v61, %v222_v53  ;;  %v259_v7 = vadd.f32 %v251_v62, %v223_v54 }
  0x95   : > { %v266_v3 = vpop.permute.xlu1 %265  ;;  %v262_v8 = vpop.permute.xlu0 %261 }
  0x96   : > { %v284_v9 = vmul.f32 %v276_v55, %v266_v3  ;;  %v285_v10 = vmul.f32 %v277_v56, %v266_v3  ;;  %v286_v11 = vmul.f32 %v278_v57, %v266_v3  ;;  %v287_v12 = vmul.f32 %v279_v58, %v266_v3 }
  0x97   : > { %v280_v13 = vmul.f32 %v276_v55, %v262_v8  ;;  %v281_v14 = vmul.f32 %v277_v56, %v262_v8  ;;  %v282_v15 = vmul.f32 %v278_v57, %v262_v8  ;;  %v283_v16 = vmul.f32 %v279_v58, %v262_v8 }
  0x98   : > { %v292_v17 = vadd.f32 %v284_v9, %v256_v4  ;;  %v293_v18 = vadd.f32 %v285_v10, %v257_v5  ;;  %v294_v19 = vadd.f32 %v286_v11, %v258_v6  ;;  %v295_v20 = vadd.f32 %v287_v12, %v259_v7 }
  0x99   : > { %v288_v21 = vadd.f32 %v280_v13, %v252_v63  ;;  %v289_v22 = vadd.f32 %v281_v14, %v253_v0  ;;  %v290_v23 = vadd.f32 %v282_v15, %v254_v1  ;;  %v291_v24 = vadd.f32 %v283_v16, %v255_v2 }
  0x9a   : > { %v300_v25 = vmax.f32 %v292_v17, 0.0  ;;  %v301_v26 = vmax.f32 %v293_v18, 0.0  ;;  %v302_v27 = vmax.f32 %v294_v19, 0.0  ;;  %v303_v28 = vmax.f32 %v295_v20, 0.0 }
  0x9b   : > { %v296_v29 = vmax.f32 %v288_v21, 0.0  ;;  %v297_v30 = vmax.f32 %v289_v22, 0.0  ;;  %v298_v31 = vmax.f32 %v290_v23, 0.0  ;;  %v299_v32 = vmax.f32 %v291_v24, 0.0 }
  0x9c   : > { %v306_v33 = vpack.c.bf16 %v301_v26, %v300_v25  ;;  %v307_v34 = vpack.c.bf16 %v303_v28, %v302_v27 }
  0x9d   : > { %v304_v35 = vpack.c.bf16 %v297_v30, %v296_v29  ;;  %v305_v36 = vpack.c.bf16 %v299_v32, %v298_v31  ;;  %318 = sbr.rel (!%p513_p4) target bundleno = 170 (0xaa), region = 36 }
  0x9e   : > { %310 = vst [vmem:[%s160_s9 + $0x10] sm:$0xff] %v306_v33 }
  0x9f   : > { %311 = vst [vmem:[%s160_s9 + $0x18] sm:$0xff] %v307_v34 }
  0xa0   : > { %308 = vst [vmem:[%s160_s9] sm:$0xff] %v304_v35 }
  0xa1   : > { %309 = vst [vmem:[%s160_s9 + $0x8] sm:$0xff] %v305_v36 }
  0xa5   : > { %v338_v39 = vld [vmem:[%s160_s9 + $0x10] sm:$0xff] }
  0xa6   : > { %v340_v40 = vld [vmem:[%s160_s9 + $0x18] sm:$0xff]  ;;  %339 = vst [vmem:[%s321_s14 + $0x20] sm:$0xff] %v338_v39 }
  0xa7   : > { %v334_v37 = vld [vmem:[%s160_s9] sm:$0xff]  ;;  %341 = vst [vmem:[%s321_s14 + $0x28] sm:$0xff] %v340_v40 }
  0xa8   : > { %v336_v38 = vld [vmem:[%s160_s9 + $0x8] sm:$0xff]  ;;  %335 = vst [vmem:[%s321_s14] sm:$0xff] %v334_v37 }
  0xa9   : > { %337 = vst [vmem:[%s321_s14 + $0x8] sm:$0xff] %v336_v38 }
  0xaa PF: > { %p10_p8 = scmp.ge.s32.totalorder %s503_s16, 4   ;;  %s555_s12 = smov %s459_s13 }
  0xab   : > { %s556_s13 = smov %s511_s19  ;;  %s557_s14 = smov %s503_s16 }
  0xac   :  { %12 = sbr.rel (!%p10_p8) target bundleno = 2 (0x2), region = 85 }

// kernel: _lambda_.4
= control target key start
LH: loop header
LB: loop body
LE: loop exit
PB: predicated region body
PF: predicated region fallthrough
CT: control target
= control target key end

     0   :  { %s2803_s12 = smov 0   ;;  %s2805_s13 = smov 0   ;;  %s3914_s0 = inlined_call_operand.vmem [shape: bf16[20,20,128], index: 0, kind: input, shape index: {}]   ;;  %s3915_s1 = inlined_call_operand.vmem [shape: bf16[5,640,128], index: 1, kind: input, shape index: {}]   ;;  %s3916_s2 = inlined_call_operand.vmem [shape: f32[1,128], index: 2, kind: input, shape index: {}]   ;;  %s3917_s3 = inlined_call_operand.vmem [shape: bf16[16,16,128], index: 3, kind: output, shape index: {}]  }
   0x1   :  { %s2807_s14 = smov 0   ;;  %s2809_s15 = smov 0  }
   0x2   :  { %s2811_s16 = smov 0  }
   0x3 LB: > { %s22_s17 = sadd.s32 1, %s2772_s14  ;;  %s25_s18 = sadd.s32 1, %s2776_s15  ;;  %s2780_s16 = sphi %s2811_s16, %s13_s16   ;;  %s2776_s15 = sphi %s2809_s15, %s4080_s15   ;;  %s2772_s14 = sphi %s2807_s14, %s4079_s14   ;;  %s2768_s13 = sphi %s2805_s13, %s4078_s13   ;;  %s2764_s12 = sphi %s2803_s12, %s4077_s12  }
   0x4   : > { %p23_p0 = scmp.ge.s32.totalorder %s22_s17, 5  ;;  %p2184_p1 = scmp.ge.s32.totalorder %s2780_s16, 1 }
   0x5   : > { %p149_p2 = scmp.lt.s32.totalorder %s2780_s16, 11 }
   0x6   : > { %s4082_s17 = smov (%p23_p0, %s22_s17), 0  ;;  %s4084_s18 = smov (!%p23_p0, %s25_s18), %s2776_s15 }
   0x7   : > { %p150_p3 = pnand %p2184_p1, %p149_p2  ;;  %p27_p4 = scmp.ge.s32.totalorder %s4084_s18, 2 }
   0x8   : > { %p174_p5 = scmp.lt.s32.totalorder (!%p150_p3), %s2764_s12, 4  ;;  %s2186_s19 = sshll.u32 (!%p150_p3), %s2768_s13, 3 }
   0x9   : > { %s4086_s18 = smov (%p27_p4, %s4084_s18), 0  ;;  %153 = sbr.rel (%p150_p3) target bundleno = 528 (0x210), region = 32 }
   0xa   : > { %p180_p6 = scmp.lt.s32.totalorder (!%p150_p3), %s2186_s19, 15  ;;  %p2190_p7 = scmp.ne.s32.totalorder (!%p150_p3), %s2764_s12, 0 }
   0xe   : > { %s175_s20 = scalar_select %p174_p5, %s2764_s12, 4 }
   0xf   : > { %s4088_s19 = smov (!%p180_p6, %s2186_s19), 15  ;;  %190 = sbr.rel (%p2190_p7) target bundleno = 187 (0xbb), region = 36 }
  0x10   : > { %s2695_s21 = smul.u32 320, %s175_s20  ;;  %s2541_s22 = sshll.u32 %s4088_s19, 3 }
  0x11   : > { %s2848_s28 = scalar_lea.vmem %s3917_s3, %s2541_s22 }
  0x12   : > { %s2843_s25 = scalar_lea.vmem %s3915_s1, %s2695_s21 }
  0x14   : > { %s2542_s29 = smul.u32 96, %s2768_s13  ;;  %v2782_v0 = vmov 0.0   ;;  %vm270_vm0 = vsmask.f32 3328  ;;  %vm271_vm1 = vsmask.f32 7440 }
  0x15   : > { %191 = vst [vmem:[#allocation2 + $0x30] sm:$0xff] %v2782_v0  ;;  %vm2918_vm2 = vmor %vm270_vm0, %vm271_vm1  ;;  %vm645_vm3 = vcmask 1042432   ;;  %vm646_vm4 = vcmask 1046532   ;;  %vm780_vm6 = vsmask.f32 2304  ;;  %vm1011_vm9 = vcmask 1041408  }
  0x16   : > { %192 = vst [vmem:[#allocation2] sm:$0xff] %v2782_v0  ;;  %s2855_s5 = scalar_lea.vmem %s3914_s0, %s2542_s29  ;;  %vm3360_vm5 = vmor %vm645_vm3, %vm646_vm4  ;;  %vm781_vm7 = vsmask.f32 6416  ;;  %vm1012_vm10 = vcmask 1045508  }
  0x17   : > { %193 = vst [vmem:[#allocation2 + $0x58] sm:$0xff] %v2782_v0  ;;  %v2858_v1 = vld [vmem:[%s2855_s5] sm:$0xf]  ;;  %v2862_v3 = vld [vmem:[%s2855_s5 + $0x4] sm:$0xf]  ;;  %vm3469_vm8 = vmor %vm780_vm6, %vm781_vm7 }
  0x18   : > { %194 = vst [vmem:[#allocation2 + $0x18] sm:$0xff] %v2782_v0  ;;  %v3944_v2 = vshrl.u32 %v2858_v1, 16  ;;  %v3940_v4 = vshll.u32 %v2858_v1, 16  ;;  %v3937_v7 = vshll.u32 %v2862_v3, 16  ;;  %v3939_v8 = vshrl.u32 %v2862_v3, 16  ;;  %vm3637_vm11 = vmor %vm1011_vm9, %vm1012_vm10 }
  0x19   : > { %195 = vst [vmem:[#allocation2 + $0x50] sm:$0xff] %v2782_v0  ;;  %v2872_v9 = vld [vmem:[%s2855_s5 + $0xc] sm:$0xf]  ;;  %v2881_v13 = vld [vmem:[%s2855_s5 + $0x10] sm:$0xf] }
  0x1a   : > { %196 = vst [vmem:[#allocation2 + $0x68] sm:$0xff] %v2782_v0  ;;  %v276_v5 = vrot.slane %v3944_v2, 4  ;;  %v279_v6 = vrot.slane %v3940_v4, 5  ;;  %v2876_v11 = vrot.slane %v3937_v7, 5  ;;  %v289_v12 = vrot.slane %v3939_v8, 4 }
  0x1b   : > { %197 = vst [vmem:[#allocation2 + $0x8] sm:$0xff] %v2782_v0  ;;  %v2884_v14 = vld [vmem:[%s2855_s5 + $0x18] sm:$0xf]  ;;  %v3935_v15 = vshrl.u32 %v2872_v9, 16  ;;  %v2888_v16 = vld [vmem:[%s2855_s5 + $0x1c] sm:$0xf] }
  0x1c   : > { %198 = vst [vmem:[#allocation2 + $0x48] sm:$0xff] %v2782_v0  ;;  %v280_v10 = vor.u32 %v279_v6, %v276_v5  ;;  %v290_v18 = vor.u32 %v289_v12, %v2876_v11  ;;  %v3934_v19 = vshll.u32 %v2872_v9, 16  ;;  %v2897_v21 = vld [vmem:[%s2855_s5 + $0x8] sm:$0x3]  ;;  %v3932_v24 = vshll.u32 %v2881_v13, 16 }
  0x1d   : > { %199 = vst [vmem:[#allocation2 + $0x40] sm:$0xff] %v2782_v0  ;;  %v300_v20 = vrot.slane %v3935_v15, 4  ;;  %v2906_v25 = vld [vmem:[%s2855_s5 + $0x24] sm:$0xf]  ;;  %v3936_v26 = vshll.u32 %v2897_v21, 16  ;;  %v3933_v28 = vshrl.u32 %v2881_v13, 16 }
  0x1e   : > { %200 = vst [vmem:[#allocation2 + $0x20] sm:$0xff] %v2782_v0  ;;  %v2890_v17 = vrot.slane %v280_v10, 4  ;;  %v2899_v22 = vrot.slane %v290_v18, 4  ;;  %v303_v23 = vrot.slane %v3934_v19, 5  ;;  %v2910_v27 = vld [vmem:[%s2855_s5 + $0x14] sm:$0x3] }
  0x1f   : > { %201 = vst [vmem:[#allocation2 + $0x10] sm:$0xff] %v2782_v0  ;;  %v2915_v29 = vld [vmem:[%s2855_s5 + $0x28] sm:$0xf]  ;;  %v2924_v32 = vrot.slane %v3932_v24, 5  ;;  %v3931_v33 = vshll.u32 %v2910_v27, 16  ;;  %v3928_v34 = vshrl.u32 %v2884_v14, 16 }
  0x20   : > { %202 = vst [vmem:[#allocation2 + $0x38] sm:$0xff] %v2782_v0  ;;  %v304_v31 = vor.u32 %v303_v23, %v300_v20  ;;  %v2931_v35 = vrot.slane %v3936_v26, 5  ;;  %v313_v36 = vrot.slane %v3933_v28, 4  ;;  %v3927_v37 = vshll.u32 %v2884_v14, 16  ;;  %v2949_v43 = vld [vmem:[%s2855_s5 + $0x30] sm:$0xf] }
  0x21   : > { %203 = vst [vmem:[#allocation2 + $0x60] sm:$0xff] %v2782_v0  ;;  %v3922_v38 = vshll.u32 %v2888_v16, 16  ;;  %v2942_v40 = vrot.slane %v3931_v33, 5  ;;  %v324_v41 = vrot.slane %v3928_v34, 4  ;;  %v3923_v42 = vshrl.u32 %v2888_v16, 16 }
  0x22   : > { %204 = vst [vmem:[#allocation2 + $0x70] sm:$0xff] %v2782_v0  ;;  %v2938_v39 = vrot.slane %v304_v31, 4  ;;  %v314_v45 = vor.u32 %v313_v36, %v2924_v32  ;;  %v327_v46 = vrot.slane %v3927_v37, 5  ;;  %v2963_v48 = vld [vmem:[%s2855_s5 + $0x20] sm:$0x3]  ;;  %v3920_v53 = vshrl.u32 %v2906_v25, 16 }
  0x23   : > { %205 = vst [vmem:[#allocation2 + $0x78] sm:$0xff] %v2782_v0  ;;  %v2960_v47 = vrot.slane %v3922_v38, 5  ;;  %v2967_v49 = vld [vmem:[%s2855_s5 + $0x34] sm:$0xf]  ;;  %v337_v51 = vrot.slane %v3923_v42, 4  ;;  %v3921_v52 = vshll.u32 %v2963_v48, 16 }
  0x24   : > { %206 = vst [vmem:[#allocation2 + $0x28] sm:$0xff] %v2782_v0  ;;  %v2978_v54 = vrot.slane %v314_v45, 4  ;;  %v328_v55 = vor.u32 %v327_v46, %v324_v41  ;;  %v3919_v56 = vshll.u32 %v2906_v25, 16  ;;  %v3918_v57 = vshll.u32 %v2915_v29, 16  ;;  %v2984_v58 = vld [vmem:[%s2855_s5 + $0x3c] sm:$0xf] }
  0x25   : > { %246 = vst [vmem:[#allocation3] sm:$0xf] %v2858_v1  ;;  %v338_v60 = vor.u32 %v337_v51, %v2960_v47  ;;  %v2993_v61 = vrot.slane %v3921_v52, 5  ;;  %v348_v62 = vrot.slane %v3920_v53, 4  ;;  %v2998_v63 = vld [vmem:[%s2855_s5 + $0x2c] sm:$0x3] }
  0x26   : > { %247 = vst [vmem:[#allocation3 + $0x14] sm:$0xf] %v2862_v3  ;;  %v3002_v0 = vld [vmem:[%s2855_s5 + $0x40] sm:$0xf]  ;;  %v3008_v6 = vrot.slane %v328_v55, 4  ;;  %v351_v10 = vrot.slane %v3919_v56, 5 }
  0x27   : > { %248 = vst [vmem:[#allocation3 + $0x28] sm:$0xf] %v2872_v9  ;;  %v3014_v12 = vrot.slane %v3918_v57, 5  ;;  %v3018_v18 = vld [vmem:[%s2855_s5 + $0x48] sm:$0xf]  ;;  %v3020_v20 = vrot.slane %v338_v60, 4 }
  0x28   : > { %249 = vst [vmem:[#allocation3 + $0x3c] sm:$0xf] %v2881_v13  ;;  %v3924_v23 = vshrl.u32 %v2915_v29, 16  ;;  %v3925_v31 = vshll.u32 %v2998_v63, 16  ;;  %v3926_v36 = vshrl.u32 %v2949_v43, 16  ;;  %v352_v46 = vor.u32 %v351_v10, %v348_v62 }
  0x29   : > { %250 = vst [vmem:[#allocation3 + $0x50] sm:$0xf] %v2884_v14  ;;  %v3027_v41 = vld [vmem:[%s2855_s5 + $0x4c] sm:$0xf]  ;;  %v3929_v51 = vshll.u32 %v2949_v43, 16  ;;  %v3930_v55 = vshll.u32 %v2967_v49, 16 }
  0x2a   : > { %251 = vst [vmem:[#allocation3 + $0x64] sm:$0xf] %v2888_v16  ;;  %v3036_v60 = vld [vmem:[%s2855_s5 + $0x38] sm:$0x3]  ;;  %v3040_v57 = vld [vmem:[%s2855_s5 + $0x54] sm:$0xf] }
  0x2b   : > { %3988 = vst [vmem:[#allocation4_spill] sm:$0xff] %v2967_v49  ;;  %v361_v53 = vrot.slane %v3924_v23, 4  ;;  %v3050_v62 = vrot.slane %v3925_v31, 5  ;;  %v372_v10 = vrot.slane %v3926_v36, 4  ;;  %v3056_v52 = vld [vmem:[%s2855_s5 + $0x58] sm:$0xf] }
  0x2c   : > { %252 = vst [vmem:[#allocation3 + $0x78] sm:$0xf] %v2906_v25  ;;  %v3058_v38 = vrot.slane %v352_v46, 4  ;;  %v375_v42 = vrot.slane %v3929_v51, 5  ;;  %v3064_v23 = vrot.slane %v3930_v55, 5  ;;  %v3938_v31 = vshrl.u32 %v2967_v49, 16 }
  0x2d   : > { %253 = vst [vmem:[#allocation3 + $0x8c] sm:$0xf] %v2915_v29  ;;  %v3069_v36 = vld [vmem:[%s2855_s5 + $0x60] sm:$0xf]  ;;  %v362_v37 = vor.u32 %v361_v53, %v3014_v12  ;;  %v3941_v46 = vshll.u32 %v3036_v60, 16  ;;  %v3942_v34 = vshrl.u32 %v2984_v58, 16 }
  0x2e   : > { %3989 = vst [vmem:[#allocation5_spill] sm:$0xff] %v2984_v58  ;;  %v3943_v51 = vshll.u32 %v2984_v58, 16  ;;  %v3077_v55 = vld [vmem:[%s2855_s5 + $0x64] sm:$0xf]  ;;  %v376_v24 = vor.u32 %v375_v42, %v372_v10  ;;  %v385_v53 = vrot.slane %v3938_v31, 4  ;;  %v3945_v28 = vshll.u32 %v3002_v0, 16 }
  0x2f   : > { %254 = vst [vmem:[#allocation3 + $0xa0] sm:$0xf] %v2949_v43  ;;  %v3087_v19 = vld [vmem:[%s2855_s5 + $0x44] sm:$0x3]  ;;  %v3091_v15 = vld [vmem:[%s2855_s5 + $0x6c] sm:$0xf] }
  0x30   : > { %3990 = vst [vmem:[#allocation6_spill] sm:$0xff] %v3002_v0  ;;  %v3093_v26 = vrot.slane %v362_v37, 4  ;;  %v3097_v7 = vrot.slane %v3941_v46, 5  ;;  %v396_v42 = vrot.slane %v3942_v34, 4  ;;  %v399_v10 = vrot.slane %v3943_v51, 5 }
  0x31   : > { %255 = vst [vmem:[#allocation3 + $0xb4] sm:$0xf] %v2967_v49  ;;  %v3105_v31 = vld [vmem:[%s2855_s5 + $0x70] sm:$0xf]  ;;  %v3107_v8 = vrot.slane %v376_v24, 4  ;;  %v386_v37 = vor.u32 %v385_v53, %v3064_v23  ;;  %v3112_v4 = vrot.slane %v3945_v28, 5 }
  0x32   : > { %3991 = vst [vmem:[#allocation7_spill] sm:$0xff] %v3018_v18  ;;  %v3946_v46 = vshrl.u32 %v3002_v0, 16  ;;  %v3117_v34 = vld [vmem:[%s2855_s5 + $0x78] sm:$0xf]  ;;  %v400_v24 = vor.u32 %v399_v10, %v396_v42  ;;  %v3947_v2 = vshll.u32 %v3087_v19, 16  ;;  %v3950_v53 = vshrl.u32 %v3018_v18, 16 }
  0x33   : > { %256 = vst [vmem:[#allocation3 + $0xc8] sm:$0xf] %v2984_v58  ;;  %v3126_v28 = vld [vmem:[%s2855_s5 + $0x50] sm:$0x3]  ;;  %v3130_v33 = vld [vmem:[%s2855_s5 + $0x7c] sm:$0xf] }
  0x34   : > { %3992 = vst [vmem:[#allocation8_spill] sm:$0xff] %v3036_v60  ;;  %v3136_v45 = vrot.slane %v386_v37, 4  ;;  %v409_v42 = vrot.slane %v3946_v46, 4  ;;  %v3953_v10 = vshll.u32 %v3018_v18, 16  ;;  %v3143_v51 = vld [vmem:[%s2855_s5 + $0x84] sm:$0xf] }
  0x35   : > { %257 = vst [vmem:[#allocation3 + $0xdc] sm:$0xf] %v3002_v0  ;;  %v3145_v5 = vrot.slane %v400_v24, 4  ;;  %v3149_v59 = vrot.slane %v3947_v2, 5  ;;  %v420_v56 = vrot.slane %v3950_v53, 4  ;;  %v3960_v37 = vshll.u32 %v3027_v41, 16 }
  0x36   : > { %258 = vst [vmem:[#allocation3 + $0xf0] sm:$0xf] %v3018_v18  ;;  %v3156_v46 = vld [vmem:[%s2855_s5 + $0x88] sm:$0xf]  ;;  %v410_v24 = vor.u32 %v409_v42, %v3112_v4  ;;  %v423_v2 = vrot.slane %v3953_v10, 5  ;;  %v3963_v42 = vshll.u32 %v3126_v28, 16 }
  0x37   : > { %259 = vst [vmem:[#allocation3 + $0x104] sm:$0xf] %v3027_v41  ;;  %v3176_v0 = vrot.slane %v3960_v37, 5  ;;  %v3964_v50 = vshrl.u32 %v3040_v57, 16  ;;  %v3994_v18 = vshrl.u32 %v3027_v41, 16  ;;  %v3966_v60 = vshll.u32 %v3040_v57, 16 }
  0x38   : > { %260 = vst [vmem:[#allocation3 + $0x118] sm:$0xf] %v3040_v57  ;;  %v3181_v10 = vrot.slane %v410_v24, 4  ;;  %v424_v44 = vor.u32 %v423_v2, %v420_v56  ;;  %v3189_v37 = vrot.slane %v3963_v42, 5  ;;  %v3965_v49 = vshll.u32 %v3056_v52, 16 }
  0x39   : > { %3993 = vst [vmem:[#allocation9_spill] sm:$0xff] %v3087_v19  ;;  %v3167_v19 = vld [vmem:[%s2855_s5 + $0x5c] sm:$0x3]  ;;  %v433_v58 = vrot.slane %v3994_v18, 4  ;;  %v444_v53 = vrot.slane %v3964_v50, 4  ;;  %v3995_v2 = vsel %vm2918_vm2, %v2890_v17, %v2876_v11  ;;  %v447_v50 = vrot.slane %v3966_v60, 5 }
  0x3a   : > { %261 = vst [vmem:[#allocation3 + $0x12c] sm:$0xf] %v3056_v52  ;;  %v416_v56 = vsel %vm2918_vm2, %v3181_v10, %v3149_v59  ;;  %v425_v18 = vrot.slane %v424_v44, 4  ;;  %v3996_v24 = vsel %vm2918_vm2, %v2899_v22, %v2931_v35  ;;  %v3214_v11 = vrot.slane %v3965_v49, 5  ;;  %v3230_v49 = vld [vmem:[%s2855_s5 + $0x68] sm:$0x3] }
  0x3b   : > { %262 = vst [vmem:[#allocation3 + $0x140] sm:$0xf] %v3069_v36  ;;  %v434_v42 = vor.u32 %v433_v58, %v3176_v0  ;;  %v3997_v17 = vshrl.u32 %v3056_v52, 16  ;;  %v461_v44 = vshll.u32 %v3167_v19, 16  ;;  %v466_v58 = vshrl.u32 %v3069_v36, 16 }
  0x3c   : > { %263 = vst [vmem:[#allocation3 + $0x154] sm:$0xf] %v3077_v55  ;;  %v3998_v59 = vsel %vm2918_vm2, %v2938_v39, %v2924_v32  ;;  %v430_v22 = vsel %vm2918_vm2, %v425_v18, %v3176_v0  ;;  %v448_v10 = vor.u32 %v447_v50, %v444_v53  ;;  %v3983_v50 = vshll.u32 %v3077_v55, 16 }
  0x3d   : > { %264 = vst [vmem:[#allocation3 + $0x168] sm:$0xf] %v3091_v15  ;;  %v435_v35 = vrot.slane %v434_v42, 4  ;;  %v463_v32 = vrot.slane %v461_v44, 5  ;;  %v468_v39 = vrot.slane %v466_v58, 4  ;;  %v4000_v0 = vsel %vm2918_vm2, %v3008_v6, %v2960_v47 }
  0x3e   : > { %265 = vst [vmem:[#allocation3 + $0x17c] sm:$0xf] %v3105_v31  ;;  %v3984_v42 = vshrl.u32 %v3077_v55, 16  ;;  %v4001_v18 = vsel %vm2918_vm2, %v3020_v20, %v2993_v61  ;;  %v477_v47 = vrot.slane %v3983_v50, 5  ;;  %v3982_v6 = vshll.u32 %v3230_v49, 16 }
  0x3f   : > { %266 = vst [vmem:[#allocation3 + $0x190] sm:$0xf] %v3117_v34 }
  0x40   : > { %267 = vst [vmem:[#allocation3 + $0x1a4] sm:$0xf] %v3130_v33  ;;  %v481_v20 = vrot.slane %v3984_v42, 4  ;;  %v4026_v42 = vshll.u32 %v2910_v27, 16 }
  0x41   : > { %268 = vst [vmem:[#allocation3 + $0x1b8] sm:$0xf] %v3143_v51 }
  0x42   : > { %269 = vst [vmem:[#allocation3 + $0x1cc] sm:$0xf] %v3156_v46 }
  0x43   : > { %585 = vst [vmem:[#allocation3 + $0x4] sm:$0xf] %v3995_v2  ;;  %v457_v2 = vrot.slane %v3997_v17, 4  ;;  %v3999_v17 = vsel %vm2918_vm2, %v2978_v54, %v2942_v40  ;;  %v440_v40 = vsel %vm2918_vm2, %v435_v35, %v3189_v37  ;;  %v449_v54 = vrot.slane %v448_v10, 4  ;;  %v3275_v10 = vld [vmem:[%s2855_s5 + $0x74] sm:$0x3] }
  0x44   : > { %586 = vst [vmem:[#allocation3 + $0x18] sm:$0xf] %v3996_v24  ;;  %v3985_v24 = vshll.u32 %v3069_v36, 16  ;;  %v3981_v37 = vshrl.u32 %v3091_v15, 16 }
  0x45   : > { %587 = vst [vmem:[#allocation3 + $0x2c] sm:$0xf] %v3998_v59  ;;  %v458_v60 = vor.u32 %v457_v2, %v3214_v11  ;;  %v4002_v59 = vsel %vm2918_vm2, %v3058_v38, %v3014_v12  ;;  %v454_v35 = vsel %vm2918_vm2, %v449_v54, %v3214_v11  ;;  %v487_v12 = vrot.slane %v3982_v6, 5 }
  0x46   : > { %588 = vst [vmem:[#allocation3 + $0x40] sm:$0xf] %v3999_v17  ;;  %v471_v53 = vrot.slane %v3985_v24, 5  ;;  %v4003_v17 = vsel %vm2918_vm2, %v3093_v26, %v3050_v62  ;;  %v492_v11 = vrot.slane %v3981_v37, 4  ;;  %v482_v62 = vor.u32 %v481_v20, %v477_v47 }
  0x47   : > { %589 = vst [vmem:[#allocation3 + $0x54] sm:$0xf] %v4000_v0  ;;  %v459_v2 = vrot.slane %v458_v60, 4  ;;  %v3980_v60 = vshll.u32 %v3091_v15, 16  ;;  %v4004_v0 = vsel %vm2918_vm2, %v3107_v8, %v3064_v23  ;;  %v3979_v54 = vshrl.u32 %v3105_v31, 16 }
  0x48   : > { %590 = vst [vmem:[#allocation3 + $0x68] sm:$0xf] %v4001_v18  ;;  %v472_v61 = vor.u32 %v471_v53, %v468_v39  ;;  %v3978_v39 = vshll.u32 %v3105_v31, 16  ;;  %v4005_v53 = vsel %vm2918_vm2, %v3136_v45, %v3097_v7  ;;  %v3977_v8 = vshll.u32 %v3275_v10, 16 }
  0x49   : > { %591 = vst [vmem:[#allocation3 + $0x7c] sm:$0xf] %v4002_v59  ;;  %v464_v38 = vsel %vm2918_vm2, %v459_v2, %v463_v32  ;;  %v495_v32 = vrot.slane %v3980_v60, 5  ;;  %v3967_v23 = vshrl.u32 %v3117_v34, 16  ;;  %v3968_v2 = vshll.u32 %v3117_v34, 16 }
  0x4a   : > { %592 = vst [vmem:[#allocation3 + $0x90] sm:$0xf] %v4003_v17  ;;  %v473_v26 = vrot.slane %v472_v61, 4  ;;  %v501_v18 = vrot.slane %v3978_v39, 5  ;;  %v4006_v59 = vsel %vm2918_vm2, %v3145_v5, %v3112_v4  ;;  %v483_v45 = vrot.slane %v482_v62, 4 }
  0x4b   : > { %593 = vst [vmem:[#allocation3 + $0xa4] sm:$0xf] %v4004_v0  ;;  %v496_v61 = vor.u32 %v495_v32, %v492_v11  ;;  %v505_v20 = vrot.slane %v3979_v54, 4  ;;  %v3317_v17 = vld [vmem:[%s2855_s5 + $0x80] sm:$0x3]  ;;  %v511_v0 = vrot.slane %v3977_v8, 5 }
  0x4c   : > { %594 = vst [vmem:[#allocation3 + $0xb8] sm:$0xf] %v4005_v53  ;;  %v478_v7 = vsel %vm2918_vm2, %v473_v26, %v477_v47  ;;  %v516_v53 = vrot.slane %v3967_v23, 4  ;;  %v519_v4 = vrot.slane %v3968_v2, 5  ;;  %v3975_v5 = vshll.u32 %v3130_v33, 16 }
  0x4d   : > { %595 = vst [vmem:[#allocation3 + $0xcc] sm:$0xf] %v4006_v59  ;;  %v488_v47 = vsel %vm2918_vm2, %v483_v45, %v487_v12  ;;  %v497_v11 = vrot.slane %v496_v61, 4  ;;  %v506_v26 = vor.u32 %v505_v20, %v501_v18  ;;  %v3976_v62 = vshrl.u32 %v3130_v33, 16 }
  0x4e   : > { %596 = vst [vmem:[#allocation3 + $0xe0] sm:$0xf] %v416_v56  ;;  %v3330_v56 = vld [vmem:[%s2855_s5 + $0x8c] sm:$0x3]  ;;  %v520_v32 = vor.u32 %v519_v4, %v516_v53  ;;  %v525_v59 = vrot.slane %v3975_v5, 5  ;;  %v3970_v23 = vshll.u32 %v3317_v17, 16 }
  0x4f   : > { %597 = vst [vmem:[#allocation3 + $0xf4] sm:$0xf] %v430_v22  ;;  %v3969_v2 = vshrl.u32 %v3143_v51, 16  ;;  %v502_v22 = vsel %vm2918_vm2, %v497_v11, %v501_v18  ;;  %v507_v12 = vrot.slane %v506_v26, 4  ;;  %v529_v45 = vrot.slane %v3976_v62, 4  ;;  %v4013_v5 = vld [vmem:[#allocation9_spill] sm:$0xff] }
  0x50   : > { %598 = vst [vmem:[#allocation3 + $0x108] sm:$0xf] %v440_v40  ;;  %v3974_v61 = vshll.u32 %v3143_v51, 16  ;;  %v521_v40 = vrot.slane %v520_v32, 4  ;;  %v535_v20 = vrot.slane %v3970_v23, 5  ;;  %v3972_v4 = vshll.u32 %v3156_v46, 16 }
  0x51   : > { %599 = vst [vmem:[#allocation3 + $0x11c] sm:$0xf] %v454_v35  ;;  %v540_v53 = vrot.slane %v3969_v2, 4  ;;  %v512_v35 = vsel %vm2918_vm2, %v507_v12, %v511_v0  ;;  %v530_v18 = vor.u32 %v529_v45, %v525_v59  ;;  %v3973_v26 = vshrl.u32 %v3156_v46, 16 }
  0x52   : > { %600 = vst [vmem:[#allocation3 + $0x130] sm:$0xf] %v464_v38  ;;  %v543_v11 = vrot.slane %v3974_v61, 5  ;;  %v526_v38 = vsel %vm2918_vm2, %v521_v40, %v525_v59  ;;  %v549_v32 = vrot.slane %v3972_v4, 5  ;;  %v3971_v2 = vshll.u32 %v3330_v56, 16 }
  0x53   : > { %601 = vst [vmem:[#allocation3 + $0x144] sm:$0xf] %v478_v7  ;;  %v531_v7 = vrot.slane %v530_v18, 4  ;;  %v553_v0 = vrot.slane %v3973_v26, 4  ;;  %v2193_v59 = vrot.slane %v2858_v1, 9  ;;  %v650_v45 = vrot.slane %v2862_v3, 5 }
  0x54   : > { %602 = vst [vmem:[#allocation3 + $0x158] sm:$0xf] %v488_v47  ;;  %v544_v23 = vor.u32 %v543_v11, %v540_v53  ;;  %v559_v47 = vrot.slane %v3971_v2, 5  ;;  %v657_v4 = vrot.slane %v2881_v13, 5  ;;  %v660_v26 = vrot.slane %v2910_v27, 5 }
  0x55   : > { %603 = vst [vmem:[#allocation3 + $0x16c] sm:$0xf] %v502_v22  ;;  %v653_v22 = vrot.slane %v2897_v21, 5  ;;  %v536_v40 = vsel %vm2918_vm2, %v531_v7, %v535_v20  ;;  %v554_v18 = vor.u32 %v553_v0, %v549_v32  ;;  %v651_v11 = vsel %vm3360_vm5, %v2193_v59, %v650_v45 }
  0x56   : > { %604 = vst [vmem:[#allocation3 + $0x180] sm:$0xf] %v512_v35  ;;  %v545_v53 = vrot.slane %v544_v23, 4  ;;  %v2194_v35 = vrot.slane %v2872_v9, 9  ;;  %v652_v2 = vrot.slane %v650_v45, 4  ;;  %v2195_v20 = vrot.slane %v2884_v14, 9 }
  0x57   : > { %605 = vst [vmem:[#allocation3 + $0x194] sm:$0xf] %v526_v38  ;;  %v555_v38 = vrot.slane %v554_v18, 4  ;;  %v664_v23 = vrot.slane %v2888_v16, 5  ;;  %v659_v59 = vrot.slane %v657_v4, 4  ;;  %v667_v45 = vrot.slane %v2963_v48, 5 }
  0x58   : > { %606 = vst [vmem:[#allocation3 + $0x1a8] sm:$0xf] %v536_v40  ;;  %v550_v61 = vsel %vm2918_vm2, %v545_v53, %v549_v32  ;;  %v654_v7 = vsel %vm3360_vm5, %v652_v2, %v653_v22  ;;  %v658_v0 = vsel %vm3360_vm5, %v2194_v35, %v657_v4  ;;  %v2196_v18 = vrot.slane %v2906_v25, 9 }
  0x59   : > { %756 = vst [vmem:[#allocation3 + $0x8] sm:$0xf] %v651_v11  ;;  %v560_v40 = vsel %vm2918_vm2, %v555_v38, %v559_v47  ;;  %v665_v32 = vsel %vm3360_vm5, %v2195_v20, %v664_v23  ;;  %v666_v53 = vrot.slane %v664_v23, 4  ;;  %v661_v2 = vsel %vm3360_vm5, %v659_v59, %v660_v26  ;;  %v4009_v47 = vld [vmem:[#allocation4_spill] sm:$0xff]  ;;  %v4011_v20 = vld [vmem:[#allocation5_spill] sm:$0xff]  ;;  %v4012_v59 = vld [vmem:[#allocation6_spill] sm:$0xff] }
  0x5a   : > { %607 = vst [vmem:[#allocation3 + $0x1bc] sm:$0xf] %v550_v61  ;;  %v671_v61 = vrot.slane %v2915_v29, 5  ;;  %v674_v4 = vrot.slane %v2998_v63, 5  ;;  %v2197_v22 = vrot.slane %v2949_v43, 9  ;;  %v678_v35 = vrot.slane %v4009_v47, 5 }
  0x5b   : > { %757 = vst [vmem:[#allocation3 + $0x1c] sm:$0xf] %v654_v7  ;;  %v668_v30 = vsel %vm3360_vm5, %v666_v53, %v667_v45  ;;  %v4010_v11 = vld [vmem:[#allocation8_spill] sm:$0xff]  ;;  %v2198_v23 = vrot.slane %v4011_v20, 9  ;;  %v688_v62 = vrot.slane %v4013_v5, 5  ;;  %v4014_v53 = vld [vmem:[#allocation7_spill] sm:$0xff] }
  0x5c   : > { %608 = vst [vmem:[#allocation3 + $0x1d0] sm:$0xf] %v560_v40  ;;  %v681_v38 = vrot.slane %v4010_v11, 5  ;;  %v672_v26 = vsel %vm3360_vm5, %v2196_v18, %v671_v61  ;;  %v673_v7 = vrot.slane %v671_v61, 4  ;;  %v685_v40 = vrot.slane %v4012_v59, 5 }
  0x5d   : > { %758 = vst [vmem:[#allocation3 + $0x30] sm:$0xf] %v658_v0  ;;  %v679_v0 = vsel %vm3360_vm5, %v2197_v22, %v678_v35  ;;  %v680_v45 = vrot.slane %v678_v35, 4  ;;  %v2199_v8 = vrot.slane %v4014_v53, 9  ;;  %v692_v39 = vrot.slane %v3027_v41, 5 }
  0x5e   : > { %759 = vst [vmem:[#allocation3 + $0x44] sm:$0xf] %v661_v2  ;;  %v675_v2 = vsel %vm3360_vm5, %v673_v7, %v674_v4  ;;  %v686_v18 = vsel %vm3360_vm5, %v2198_v23, %v685_v40  ;;  %v687_v61 = vrot.slane %v685_v40, 4  ;;  %v695_v54 = vrot.slane %v3126_v28, 5 }
  0x5f   : > { %760 = vst [vmem:[#allocation3 + $0x58] sm:$0xf] %v665_v32  ;;  %v682_v32 = vsel %vm3360_vm5, %v680_v45, %v681_v38  ;;  %v693_v22 = vsel %vm3360_vm5, %v2199_v8, %v692_v39  ;;  %v694_v35 = vrot.slane %v692_v39, 4  ;;  %v2200_v60 = vrot.slane %v3040_v57, 9 }
  0x60   : > { %761 = vst [vmem:[#allocation3 + $0x6c] sm:$0xf] %v668_v30  ;;  %v689_v4 = vsel %vm3360_vm5, %v687_v61, %v688_v62  ;;  %v699_v30 = vrot.slane %v3056_v52, 5  ;;  %v702_v23 = vrot.slane %v3167_v19, 5  ;;  %v2201_v7 = vrot.slane %v3069_v36, 9 }
  0x61   : > { %762 = vst [vmem:[#allocation3 + $0x80] sm:$0xf] %v672_v26  ;;  %v696_v38 = vsel %vm3360_vm5, %v694_v35, %v695_v54  ;;  %v706_v26 = vrot.slane %v3077_v55, 5  ;;  %v709_v39 = vrot.slane %v3230_v49, 5  ;;  %v2202_v8 = vrot.slane %v3091_v15, 9 }
  0x62   : > { %763 = vst [vmem:[#allocation3 + $0x94] sm:$0xf] %v675_v2  ;;  %v700_v62 = vsel %vm3360_vm5, %v2200_v60, %v699_v30  ;;  %v701_v40 = vrot.slane %v699_v30, 4  ;;  %v713_v45 = vrot.slane %v3105_v31, 5  ;;  %v716_v2 = vrot.slane %v3275_v10, 5 }
  0x63   : > { %764 = vst [vmem:[#allocation3 + $0xa8] sm:$0xf] %v679_v0  ;;  %v707_v0 = vsel %vm3360_vm5, %v2201_v7, %v706_v26  ;;  %v708_v54 = vrot.slane %v706_v26, 4  ;;  %v2203_v61 = vrot.slane %v3117_v34, 9  ;;  %v720_v35 = vrot.slane %v3130_v33, 5 }
  0x64   : > { %765 = vst [vmem:[#allocation3 + $0xbc] sm:$0xf] %v682_v32  ;;  %v703_v32 = vsel %vm3360_vm5, %v701_v40, %v702_v23  ;;  %v714_v60 = vsel %vm3360_vm5, %v2202_v8, %v713_v45  ;;  %v715_v30 = vrot.slane %v713_v45, 4  ;;  %v723_v37 = vrot.slane %v3317_v17, 5 }
  0x65   : > { %766 = vst [vmem:[#allocation3 + $0xd0] sm:$0xf] %v686_v18  ;;  %v710_v18 = vsel %vm3360_vm5, %v708_v54, %v709_v39  ;;  %v721_v7 = vsel %vm3360_vm5, %v2203_v61, %v720_v35  ;;  %v722_v26 = vrot.slane %v720_v35, 4  ;;  %v2204_v6 = vrot.slane %v3143_v51, 9 }
  0x66   : > { %767 = vst [vmem:[#allocation3 + $0xe4] sm:$0xf] %v689_v4  ;;  %v717_v4 = vsel %vm3360_vm5, %v715_v30, %v716_v2  ;;  %v727_v23 = vrot.slane %v3156_v46, 5  ;;  %v730_v8 = vrot.slane %v3330_v56, 5  ;;  %v4015_v39 = vshrl.u32 %v2858_v1, 16 }
  0x67   : > { %768 = vst [vmem:[#allocation3 + $0xf8] sm:$0xf] %v693_v22  ;;  %v724_v22 = vsel %vm3360_vm5, %v722_v26, %v723_v37  ;;  %v4016_v45 = vshll.u32 %v2858_v1, 16  ;;  %v4017_v61 = vshrl.u32 %v2862_v3, 16  ;;  %v792_v26 = vshrl.u32 %v2897_v21, 16 }
  0x68   : > { %769 = vst [vmem:[#allocation3 + $0x10c] sm:$0xf] %v696_v38  ;;  %v783_v40 = vrot.slane %v4015_v39, 5  ;;  %v728_v38 = vsel %vm3360_vm5, %v2204_v6, %v727_v23  ;;  %v729_v2 = vrot.slane %v727_v23, 4  ;;  %v4019_v39 = vshll.u32 %v2897_v21, 16 }
  0x69   : > { %770 = vst [vmem:[#allocation3 + $0x120] sm:$0xf] %v700_v62  ;;  %v784_v54 = vrot.slane %v4016_v45, 6  ;;  %v787_v35 = vrot.slane %v4017_v61, 5  ;;  %v4018_v62 = vshll.u32 %v2862_v3, 16  ;;  %v4020_v45 = vshrl.u32 %v2872_v9, 16 }
  0x6a   : > { %771 = vst [vmem:[#allocation3 + $0x134] sm:$0xf] %v703_v32  ;;  %v795_v50 = vrot.slane %v4019_v39, 6  ;;  %v731_v6 = vsel %vm3360_vm5, %v729_v2, %v730_v8  ;;  %v4024_v21 = vshrl.u32 %v2881_v13, 16  ;;  %v794_v39 = vrot.slane %v792_v26, 5 }
  0x6b   : > { %v788_v30 = vrot.slane %v4018_v62, 6  ;;  %772 = vst [vmem:[#allocation3 + $0x148] sm:$0xf] %v707_v0  ;;  %v785_v37 = vor.u32 %v784_v54, %v783_v40  ;;  %v798_v32 = vrot.slane %v4020_v45, 5  ;;  %v4023_v40 = vshll.u32 %v2872_v9, 16 }
  0x6c   : > { %773 = vst [vmem:[#allocation3 + $0x15c] sm:$0xf] %v710_v18  ;;  %v802_v61 = vrot.slane %v4024_v21, 5  ;;  %v4025_v18 = vshll.u32 %v2881_v13, 16  ;;  %v807_v8 = vshrl.u32 %v2910_v27, 16  ;;  %v4028_v24 = vshll.u32 %v2884_v14, 16 }
  0x6d   : > { %v789_v0 = vor.u32 %v788_v30, %v787_v35  ;;  %v799_v54 = vrot.slane %v4023_v40, 6  ;;  %774 = vst [vmem:[#allocation3 + $0x170] sm:$0xf] %v714_v60  ;;  %v786_v62 = vrot.slane %v785_v37, 4  ;;  %v810_v35 = vrot.slane %v4026_v42, 6 }
  0x6e   : > { %v803_v12 = vrot.slane %v4025_v18, 6  ;;  %775 = vst [vmem:[#allocation3 + $0x184] sm:$0xf] %v717_v4  ;;  %v4027_v30 = vshrl.u32 %v2884_v14, 16  ;;  %v796_v37 = vor.u32 %v795_v50, %v794_v39  ;;  %v809_v21 = vrot.slane %v807_v8, 5 }
  0x6f   : > { %v791_v2 = vrot.slane %v789_v0, 4  ;;  %v800_v45 = vor.u32 %v799_v54, %v798_v32  ;;  %776 = vst [vmem:[#allocation3 + $0x198] sm:$0xf] %v721_v7  ;;  %v790_v60 = vsel %vm3469_vm8, %v786_v62, %v789_v0  ;;  %v814_v4 = vrot.slane %v4028_v24, 6 }
  0x70   : > { %v813_v40 = vrot.slane %v4027_v30, 5  ;;  %v804_v26 = vor.u32 %v803_v12, %v802_v61  ;;  %777 = vst [vmem:[#allocation3 + $0x1ac] sm:$0xf] %v724_v22  ;;  %v4029_v32 = vshrl.u32 %v2888_v16, 16  ;;  %v4030_v27 = vshll.u32 %v2888_v16, 16 }
  0x71   : > { %v801_v18 = vrot.slane %v800_v45, 4  ;;  %778 = vst [vmem:[#allocation3 + $0x1c0] sm:$0xf] %v728_v38  ;;  %v797_v7 = vsel %vm3469_vm8, %v791_v2, %v796_v37  ;;  %v811_v0 = vor.u32 %v810_v35, %v809_v21  ;;  %v822_v50 = vshrl.u32 %v2963_v48, 16 }
  0x72   : > { %v817_v54 = vrot.slane %v4029_v32, 5  ;;  %v818_v42 = vrot.slane %v4030_v27, 6  ;;  %v806_v30 = vrot.slane %v804_v26, 4  ;;  %779 = vst [vmem:[#allocation3 + $0x1d4] sm:$0xf] %v731_v6  ;;  %v815_v61 = vor.u32 %v814_v4, %v813_v40 }
  0x73   : > { %v805_v22 = vsel %vm3469_vm8, %v801_v18, %v804_v26  ;;  %v4031_v62 = vshll.u32 %v2963_v48, 16  ;;  %987 = vst [vmem:[#allocation3 + $0xc] sm:$0xf] %v790_v60  ;;  %v824_v12 = vrot.slane %v822_v50, 5  ;;  %v4032_v8 = vshrl.u32 %v2906_v25, 16 }
  0x74   : > { %v819_v24 = vor.u32 %v818_v42, %v817_v54  ;;  %v812_v38 = vsel %vm3469_vm8, %v806_v30, %v811_v0  ;;  %v4033_v45 = vshll.u32 %v2906_v25, 16  ;;  %988 = vst [vmem:[#allocation3 + $0x20] sm:$0xf] %v797_v7  ;;  %v816_v6 = vrot.slane %v815_v61, 4 }
  0x75   : > { %v825_v39 = vrot.slane %v4031_v62, 6  ;;  %v828_v2 = vrot.slane %v4032_v8, 5  ;;  %v4034_v40 = vshrl.u32 %v2915_v29, 16  ;;  %v4035_v48 = vshll.u32 %v2915_v29, 16  ;;  %989 = vst [vmem:[#allocation3 + $0x34] sm:$0xf] %v805_v22 }
  0x76   : > { %v829_v35 = vrot.slane %v4033_v45, 6  ;;  %v821_v37 = vrot.slane %v819_v24, 4  ;;  %v837_v4 = vshrl.u32 %v2998_v63, 16  ;;  %v4036_v32 = vshll.u32 %v2998_v63, 16  ;;  %990 = vst [vmem:[#allocation3 + $0x48] sm:$0xf] %v812_v38 }
  0x77   : > { %v832_v26 = vrot.slane %v4034_v40, 5  ;;  %v833_v21 = vrot.slane %v4035_v48, 6  ;;  %v826_v60 = vor.u32 %v825_v39, %v824_v12  ;;  %v820_v27 = vsel %vm3469_vm8, %v816_v6, %v819_v24 }
  0x78   : > { %v830_v18 = vor.u32 %v829_v35, %v828_v2  ;;  %v840_v54 = vrot.slane %v4036_v32, 6  ;;  %v4037_v7 = vshrl.u32 %v2949_v43, 16  ;;  %v4038_v0 = vshll.u32 %v2949_v43, 16  ;;  %991 = vst [vmem:[#allocation3 + $0x5c] sm:$0xf] %v820_v27 }
  0x79   : > { %v834_v42 = vor.u32 %v833_v21, %v832_v26  ;;  %v827_v22 = vsel %vm3469_vm8, %v821_v37, %v826_v60  ;;  %v839_v62 = vrot.slane %v837_v4, 5  ;;  %v4039_v63 = vshrl.u32 %v4009_v47, 16 }
  0x7a   : > { %v843_v30 = vrot.slane %v4037_v7, 5  ;;  %v844_v50 = vrot.slane %v4038_v0, 6  ;;  %v831_v61 = vrot.slane %v830_v18, 4  ;;  %992 = vst [vmem:[#allocation3 + $0x70] sm:$0xf] %v827_v22  ;;  %v4040_v24 = vshll.u32 %v4009_v47, 16 }
  0x7b   : > { %v847_v39 = vrot.slane %v4039_v63, 5  ;;  %v836_v38 = vrot.slane %v834_v42, 4  ;;  %v852_v2 = vshrl.u32 %v4010_v11, 16  ;;  %v841_v35 = vor.u32 %v840_v54, %v839_v62 }
  0x7c   : > { %v845_v12 = vor.u32 %v844_v50, %v843_v30  ;;  %v848_v8 = vrot.slane %v4040_v24, 6  ;;  %v835_v45 = vsel %vm3469_vm8, %v831_v61, %v834_v42  ;;  %v4041_v6 = vshll.u32 %v4010_v11, 16 }
  0x7d   : > { %v4042_v40 = vshrl.u32 %v4011_v20, 16  ;;  %993 = vst [vmem:[#allocation3 + $0x84] sm:$0xf] %v835_v45  ;;  %v854_v60 = vrot.slane %v852_v2, 5  ;;  %v4043_v18 = vshll.u32 %v4011_v20, 16  ;;  %v842_v32 = vsel %vm3469_vm8, %v836_v38, %v841_v35 }
  0x7e   : > { %v855_v37 = vrot.slane %v4041_v6, 6  ;;  %v846_v48 = vrot.slane %v845_v12, 4  ;;  %v849_v21 = vor.u32 %v848_v8, %v847_v39  ;;  %v4044_v27 = vshrl.u32 %v4012_v59, 16  ;;  %994 = vst [vmem:[#allocation3 + $0x98] sm:$0xf] %v842_v32 }
  0x7f   : > { %v858_v26 = vrot.slane %v4042_v40, 5  ;;  %v859_v4 = vrot.slane %v4043_v18, 6  ;;  %v4045_v54 = vshll.u32 %v4012_v59, 16  ;;  %v867_v30 = vshrl.u32 %v4013_v5, 16 }
  0x80   : > { %v862_v42 = vrot.slane %v4044_v27, 5  ;;  %v850_v0 = vsel %vm3469_vm8, %v846_v48, %v849_v21  ;;  %v851_v50 = vrot.slane %v849_v21, 4  ;;  %v856_v22 = vor.u32 %v855_v37, %v854_v60 }
  0x81   : > { %v863_v7 = vrot.slane %v4045_v54, 6  ;;  %v860_v61 = vor.u32 %v859_v4, %v858_v26  ;;  %995 = vst [vmem:[#allocation3 + $0xac] sm:$0xf] %v850_v0  ;;  %v869_v63 = vrot.slane %v867_v30, 5  ;;  %v4046_v39 = vshll.u32 %v4013_v5, 16 }
  0x82   : > { %v4047_v12 = vshrl.u32 %v4014_v53, 16  ;;  %v857_v8 = vsel %vm3469_vm8, %v851_v50, %v856_v22  ;;  %v4048_v45 = vshll.u32 %v4014_v53, 16  ;;  %v4049_v6 = vshrl.u32 %v3027_v41, 16 }
  0x83   : > { %v864_v62 = vor.u32 %v863_v7, %v862_v42  ;;  %v870_v38 = vrot.slane %v4046_v39, 6  ;;  %v861_v2 = vrot.slane %v860_v61, 4  ;;  %996 = vst [vmem:[#allocation3 + $0xc0] sm:$0xf] %v857_v8  ;;  %v4050_v48 = vshll.u32 %v3027_v41, 16 }
  0x84   : > { %v873_v24 = vrot.slane %v4047_v12, 5  ;;  %v874_v35 = vrot.slane %v4048_v45, 6  ;;  %v877_v37 = vrot.slane %v4049_v6, 5  ;;  %v882_v60 = vshrl.u32 %v3126_v28, 16 }
  0x85   : > { %v866_v40 = vrot.slane %v864_v62, 4  ;;  %v871_v26 = vor.u32 %v870_v38, %v869_v63  ;;  %v878_v21 = vrot.slane %v4050_v48, 6  ;;  %v865_v18 = vsel %vm3469_vm8, %v861_v2, %v864_v62 }
  0x86   : > { %v875_v4 = vor.u32 %v874_v35, %v873_v24  ;;  %v4051_v32 = vshll.u32 %v3126_v28, 16  ;;  %v4052_v42 = vshrl.u32 %v3040_v57, 16  ;;  %997 = vst [vmem:[#allocation3 + $0xd4] sm:$0xf] %v865_v18  ;;  %v884_v0 = vrot.slane %v882_v60, 5 }
  0x87   : > { %v872_v7 = vsel %vm3469_vm8, %v866_v40, %v871_v26  ;;  %v879_v30 = vor.u32 %v878_v21, %v877_v37  ;;  %v4053_v50 = vshll.u32 %v3040_v57, 16  ;;  %v4054_v62 = vshrl.u32 %v3056_v52, 16 }
  0x88   : > { %v885_v27 = vrot.slane %v4051_v32, 6  ;;  %v888_v54 = vrot.slane %v4052_v42, 5  ;;  %998 = vst [vmem:[#allocation3 + $0xe8] sm:$0xf] %v872_v7  ;;  %v876_v61 = vrot.slane %v875_v4, 4  ;;  %v4055_v39 = vshll.u32 %v3056_v52, 16 }
  0x89   : > { %v889_v22 = vrot.slane %v4053_v50, 6  ;;  %v892_v63 = vrot.slane %v4054_v62, 5  ;;  %v897_v12 = vshrl.u32 %v3167_v19, 16  ;;  %v881_v24 = vrot.slane %v879_v30, 4 }
  0x8a   : > { %v893_v38 = vrot.slane %v4055_v39, 6  ;;  %v886_v8 = vor.u32 %v885_v27, %v884_v0  ;;  %v900_v45 = vrot.slane %v461_v44, 6  ;;  %v880_v35 = vsel %vm3469_vm8, %v876_v61, %v879_v30 }
  0x8b   : > { %v890_v2 = vor.u32 %v889_v22, %v888_v54  ;;  %v899_v37 = vrot.slane %v897_v12, 5  ;;  %v903_v40 = vrot.slane %v466_v58, 5  ;;  %999 = vst [vmem:[#allocation3 + $0xfc] sm:$0xf] %v880_v35  ;;  %v4056_v21 = vshll.u32 %v3069_v36, 16 }
  0x8c   : > { %v894_v6 = vor.u32 %v893_v38, %v892_v63  ;;  %v887_v26 = vsel %vm3469_vm8, %v881_v24, %v886_v8  ;;  %v4057_v18 = vshrl.u32 %v3077_v55, 16  ;;  %v4058_v27 = vshll.u32 %v3077_v55, 16 }
  0x8d   : > { %v891_v48 = vrot.slane %v890_v2, 4  ;;  %v904_v60 = vrot.slane %v4056_v21, 6  ;;  %1000 = vst [vmem:[#allocation3 + $0x110] sm:$0xf] %v887_v26  ;;  %v901_v32 = vor.u32 %v900_v45, %v899_v37  ;;  %v912_v54 = vshrl.u32 %v3230_v49, 16 }
  0x8e   : > { %v907_v4 = vrot.slane %v4057_v18, 5  ;;  %v896_v44 = vrot.slane %v894_v6, 4  ;;  %v908_v42 = vrot.slane %v4058_v27, 6  ;;  %v4059_v30 = vshll.u32 %v3230_v49, 16 }
  0x8f   : > { %v895_v58 = vsel %vm3469_vm8, %v891_v48, %v894_v6  ;;  %v905_v7 = vor.u32 %v904_v60, %v903_v40  ;;  %v4060_v50 = vshrl.u32 %v3091_v15, 16  ;;  %v914_v63 = vrot.slane %v912_v54, 5 }
  0x90   : > { %v915_v0 = vrot.slane %v4059_v30, 6  ;;  %1001 = vst [vmem:[#allocation3 + $0x124] sm:$0xf] %v895_v58  ;;  %v902_v61 = vsel %vm3469_vm8, %v896_v44, %v901_v32  ;;  %v909_v62 = vor.u32 %v908_v42, %v907_v4  ;;  %v4061_v39 = vshll.u32 %v3091_v15, 16 }
  0x91   : > { %v918_v22 = vrot.slane %v4060_v50, 5  ;;  %1002 = vst [vmem:[#allocation3 + $0x138] sm:$0xf] %v902_v61  ;;  %v906_v12 = vrot.slane %v905_v7, 4  ;;  %v4062_v24 = vshrl.u32 %v3105_v31, 16  ;;  %v4063_v2 = vshll.u32 %v3105_v31, 16 }
  0x92   : > { %v919_v38 = vrot.slane %v4061_v39, 6  ;;  %v927_v35 = vshrl.u32 %v3275_v10, 16  ;;  %v911_v6 = vrot.slane %v909_v62, 4  ;;  %v916_v37 = vor.u32 %v915_v0, %v914_v63 }
  0x93   : > { %v922_v8 = vrot.slane %v4062_v24, 5  ;;  %v923_v45 = vrot.slane %v4063_v2, 6  ;;  %v4064_v26 = vshll.u32 %v3275_v10, 16  ;;  %v910_v21 = vsel %vm3469_vm8, %v906_v12, %v909_v62 }
  0x94   : > { %v920_v40 = vor.u32 %v919_v38, %v918_v22  ;;  %v929_v18 = vrot.slane %v927_v35, 5  ;;  %v4065_v4 = vshrl.u32 %v3117_v34, 16  ;;  %1003 = vst [vmem:[#allocation3 + $0x14c] sm:$0xf] %v910_v21  ;;  %v917_v32 = vsel %vm3469_vm8, %v911_v6, %v916_v37 }
  0x95   : > { %v930_v48 = vrot.slane %v4064_v26, 6  ;;  %v924_v60 = vor.u32 %v923_v45, %v922_v8  ;;  %v4066_v42 = vshll.u32 %v3117_v34, 16  ;;  %v4067_v58 = vshrl.u32 %v3130_v33, 16  ;;  %1004 = vst [vmem:[#allocation3 + $0x160] sm:$0xf] %v917_v32 }
  0x96   : > { %v933_v44 = vrot.slane %v4065_v4, 5  ;;  %v921_v27 = vrot.slane %v920_v40, 4  ;;  %v4068_v50 = vshll.u32 %v3130_v33, 16  ;;  %v942_v61 = vshrl.u32 %v3317_v17, 16 }
  0x97   : > { %v934_v54 = vrot.slane %v4066_v42, 6  ;;  %v937_v7 = vrot.slane %v4067_v58, 5  ;;  %v926_v30 = vrot.slane %v924_v60, 4  ;;  %v931_v0 = vor.u32 %v930_v48, %v929_v18 }
  0x98   : > { %v938_v22 = vrot.slane %v4068_v50, 6  ;;  %v925_v62 = vsel %vm3469_vm8, %v921_v27, %v924_v60  ;;  %v4069_v39 = vshll.u32 %v3317_v17, 16  ;;  %v4070_v12 = vshrl.u32 %v3143_v51, 16 }
  0x99   : > { %v935_v63 = vor.u32 %v934_v54, %v933_v44  ;;  %1005 = vst [vmem:[#allocation3 + $0x174] sm:$0xf] %v925_v62  ;;  %v932_v8 = vsel %vm3469_vm8, %v926_v30, %v931_v0  ;;  %v944_v45 = vrot.slane %v942_v61, 5  ;;  %v4071_v35 = vshll.u32 %v3143_v51, 16 }
  0x9a   : > { %v945_v38 = vrot.slane %v4069_v39, 6  ;;  %v948_v24 = vrot.slane %v4070_v12, 5  ;;  %v939_v2 = vor.u32 %v938_v22, %v937_v7  ;;  %1006 = vst [vmem:[#allocation3 + $0x188] sm:$0xf] %v932_v8  ;;  %v4072_v40 = vshrl.u32 %v3156_v46, 16 }
  0x9b   : > { %v949_v6 = vrot.slane %v4071_v35, 6  ;;  %v936_v37 = vrot.slane %v935_v63, 4  ;;  %v4073_v48 = vshll.u32 %v3156_v46, 16  ;;  %v957_v60 = vshrl.u32 %v3330_v56, 16  ;;  %v2737_v63 = vld [vmem:[%s2855_s5 + $0x8] sm:$0x3] }
  0x9c   : > { %v952_v26 = vrot.slane %v4072_v40, 5  ;;  %v941_v18 = vrot.slane %v939_v2, 4  ;;  %v946_v4 = vor.u32 %v945_v38, %v944_v45  ;;  %v4074_v32 = vshll.u32 %v3330_v56, 16 }
  0x9d   : > { %v953_v21 = vrot.slane %v4073_v48, 6  ;;  %v950_v44 = vor.u32 %v949_v6, %v948_v24  ;;  %v940_v42 = vsel %vm3469_vm8, %v936_v37, %v939_v2  ;;  %v959_v58 = vrot.slane %v957_v60, 5  ;;  %v2739_v37 = vld [vmem:[%s2855_s5 + $0x20] sm:$0x3] }
  0x9e   : > { %v960_v27 = vrot.slane %v4074_v32, 6  ;;  %1007 = vst [vmem:[#allocation3 + $0x19c] sm:$0xf] %v940_v42  ;;  %v947_v7 = vsel %vm3469_vm8, %v941_v18, %v946_v4  ;;  %v2205_v0 = vrot.slane %v2858_v1, 10  ;;  %v1016_v62 = vrot.slane %v2862_v3, 6 }
  0x9f   : > { %v954_v54 = vor.u32 %v953_v21, %v952_v26  ;;  %v951_v30 = vrot.slane %v950_v44, 4  ;;  %1008 = vst [vmem:[#allocation3 + $0x1b0] sm:$0xf] %v947_v7  ;;  %v1019_v39 = vrot.slane %v2737_v63, 6  ;;  %v2206_v12 = vrot.slane %v2872_v9, 10 }
  0xa0   : > { %v961_v22 = vor.u32 %v960_v27, %v959_v58  ;;  %v1023_v24 = vrot.slane %v2881_v13, 6  ;;  %v2738_v1 = vld [vmem:[%s2855_s5 + $0x14] sm:$0x3]  ;;  %v1017_v3 = vsel %vm3637_vm11, %v2205_v0, %v1016_v62  ;;  %v1018_v45 = vrot.slane %v1016_v62, 4  ;;  %v2740_v21 = vld [vmem:[%s2855_s5 + $0x2c] sm:$0x3] }
  0xa1   : > { %v956_v50 = vrot.slane %v954_v54, 4  ;;  %v955_v38 = vsel %vm3469_vm8, %v951_v30, %v954_v54  ;;  %v1026_v8 = vrot.slane %v2738_v1, 6  ;;  %v2207_v35 = vrot.slane %v2884_v14, 10  ;;  %1122 = vst [vmem:[#allocation3 + $0x10] sm:$0xf] %v1017_v3 }
  0xa2   : > { %1009 = vst [vmem:[#allocation3 + $0x1c4] sm:$0xf] %v955_v38  ;;  %v1024_v6 = vsel %vm3637_vm11, %v2206_v12, %v1023_v24  ;;  %v1025_v9 = vrot.slane %v1023_v24, 4  ;;  %v1030_v13 = vrot.slane %v2888_v16, 6  ;;  %v1033_v40 = vrot.slane %v2739_v37, 6 }
  0xa3   : > { %v962_v2 = vsel %vm3469_vm8, %v956_v50, %v961_v22  ;;  %v1020_v23 = vsel %vm3637_vm11, %v1018_v45, %v1019_v39  ;;  %v2208_v26 = vrot.slane %v2906_v25, 10  ;;  %v1037_v48 = vrot.slane %v2915_v29, 6  ;;  %1124 = vst [vmem:[#allocation3 + $0x38] sm:$0xf] %v1024_v6 }
  0xa4   : > { %1010 = vst [vmem:[#allocation3 + $0x1d8] sm:$0xf] %v962_v2  ;;  %v1040_v60 = vrot.slane %v2740_v21, 6  ;;  %v1027_v14 = vsel %vm3637_vm11, %v1025_v9, %v1026_v8  ;;  %v1031_v18 = vsel %vm3637_vm11, %v2207_v35, %v1030_v13  ;;  %v1032_v16 = vrot.slane %v1030_v13, 4 }
  0xa5   : > { %1123 = vst [vmem:[#allocation3 + $0x24] sm:$0xf] %v1020_v23  ;;  %v2209_v4 = vrot.slane %v2949_v43, 10  ;;  %v1039_v44 = vrot.slane %v1037_v48, 4  ;;  %v1044_v32 = vrot.slane %v4009_v47, 6  ;;  %v1047_v25 = vrot.slane %v4010_v11, 6 }
  0xa6   : > { %1125 = vst [vmem:[#allocation3 + $0x4c] sm:$0xf] %v1027_v14  ;;  %v1034_v29 = vsel %vm3637_vm11, %v1032_v16, %v1033_v40  ;;  %v1038_v27 = vsel %vm3637_vm11, %v2208_v26, %v1037_v48  ;;  %v2210_v42 = vrot.slane %v4011_v20, 10  ;;  %v1051_v54 = vrot.slane %v4012_v59, 6 }
  0xa7   : > { %1126 = vst [vmem:[#allocation3 + $0x60] sm:$0xf] %v1031_v18  ;;  %v1041_v43 = vsel %vm3637_vm11, %v1039_v44, %v1040_v60  ;;  %v1046_v58 = vrot.slane %v1044_v32, 4  ;;  %v1054_v47 = vrot.slane %v4013_v5, 6  ;;  %v1045_v11 = vsel %vm3637_vm11, %v2209_v4, %v1044_v32 }
  0xa8   : > { %1127 = vst [vmem:[#allocation3 + $0x74] sm:$0xf] %v1034_v29  ;;  %v1053_v7 = vrot.slane %v1051_v54, 4  ;;  %v2211_v30 = vrot.slane %v4014_v53, 10  ;;  %v1058_v0 = vrot.slane %v3027_v41, 6  ;;  %v1061_v59 = vrot.slane %v3126_v28, 6 }
  0xa9   : > { %1128 = vst [vmem:[#allocation3 + $0x88] sm:$0xf] %v1038_v27  ;;  %v1048_v20 = vsel %vm3637_vm11, %v1046_v58, %v1047_v25  ;;  %v1065_v50 = vrot.slane %v3056_v52, 6  ;;  %v1052_v5 = vsel %vm3637_vm11, %v2210_v42, %v1051_v54  ;;  %v2212_v62 = vrot.slane %v3040_v57, 10 }
  0xaa   : > { %1129 = vst [vmem:[#allocation3 + $0x9c] sm:$0xf] %v1041_v43  ;;  %v1060_v22 = vrot.slane %v1058_v0, 4  ;;  %v1055_v53 = vsel %vm3637_vm11, %v1053_v7, %v1054_v47  ;;  %v1068_v63 = vrot.slane %v3167_v19, 6  ;;  %v1072_v39 = vrot.slane %v3077_v55, 6 }
  0xab   : > { %1130 = vst [vmem:[#allocation3 + $0xb0] sm:$0xf] %v1045_v11  ;;  %v1067_v41 = vrot.slane %v1065_v50, 4  ;;  %v1059_v28 = vsel %vm3637_vm11, %v2211_v30, %v1058_v0  ;;  %v2213_v52 = vrot.slane %v3069_v36, 10  ;;  %v1079_v38 = vrot.slane %v3105_v31, 6 }
  0xac   : > { %1131 = vst [vmem:[#allocation3 + $0xc4] sm:$0xf] %v1048_v20  ;;  %v1062_v57 = vsel %vm3637_vm11, %v1060_v22, %v1061_v59  ;;  %v1074_v12 = vrot.slane %v1072_v39, 4  ;;  %v1075_v24 = vrot.slane %v3230_v49, 6  ;;  %v1066_v19 = vsel %vm3637_vm11, %v2212_v62, %v1065_v50 }
  0xad   : > { %1132 = vst [vmem:[#allocation3 + $0xd8] sm:$0xf] %v1052_v5  ;;  %v2214_v55 = vrot.slane %v3091_v15, 10  ;;  %v1086_v1 = vrot.slane %v3130_v33, 6  ;;  %v1069_v36 = vsel %vm3637_vm11, %v1067_v41, %v1068_v63  ;;  %v1081_v31 = vrot.slane %v1079_v38, 4 }
  0xae   : > { %1133 = vst [vmem:[#allocation3 + $0xec] sm:$0xf] %v1055_v53  ;;  %v1082_v8 = vrot.slane %v3275_v10, 6  ;;  %v1093_v2 = vrot.slane %v3156_v46, 6  ;;  %v1073_v49 = vsel %vm3637_vm11, %v2213_v52, %v1072_v39  ;;  %v2215_v3 = vrot.slane %v3117_v34, 10 }
  0xaf   : > { %1134 = vst [vmem:[#allocation3 + $0x100] sm:$0xf] %v1059_v28  ;;  %v1076_v15 = vsel %vm3637_vm11, %v1074_v12, %v1075_v24  ;;  %v1088_v33 = vrot.slane %v1086_v1, 4  ;;  %v1089_v45 = vrot.slane %v3317_v17, 6  ;;  %v1080_v35 = vsel %vm3637_vm11, %v2214_v55, %v1079_v38 }
  0xb0   : > { %1135 = vst [vmem:[#allocation3 + $0x114] sm:$0xf] %v1062_v57  ;;  %v2216_v10 = vrot.slane %v3143_v51, 10  ;;  %v1083_v46 = vsel %vm3637_vm11, %v1081_v31, %v1082_v8  ;;  %v1095_v6 = vrot.slane %v1093_v2, 4  ;;  %v1096_v34 = vrot.slane %v3330_v56, 6 }
  0xb1   : > { %1136 = vst [vmem:[#allocation3 + $0x128] sm:$0xf] %v1066_v19  ;;  %v1087_v9 = vsel %vm3637_vm11, %v2215_v3, %v1086_v1  ;;  %v1090_v17 = vsel %vm3637_vm11, %v1088_v33, %v1089_v45 }
  0xb2   : > { %1137 = vst [vmem:[#allocation3 + $0x13c] sm:$0xf] %v1069_v36  ;;  %v1094_v13 = vsel %vm3637_vm11, %v2216_v10, %v1093_v2  ;;  %v1097_v51 = vsel %vm3637_vm11, %v1095_v6, %v1096_v34 }
  0xb3   : > { %1138 = vst [vmem:[#allocation3 + $0x150] sm:$0xf] %v1073_v49 }
  0xb4   : > { %1139 = vst [vmem:[#allocation3 + $0x164] sm:$0xf] %v1076_v15 }
  0xb5   : > { %1140 = vst [vmem:[#allocation3 + $0x178] sm:$0xf] %v1080_v35 }
  0xb6   : > { %1141 = vst [vmem:[#allocation3 + $0x18c] sm:$0xf] %v1083_v46 }
  0xb7   : > { %1142 = vst [vmem:[#allocation3 + $0x1a0] sm:$0xf] %v1087_v9 }
  0xb8   : > { %1143 = vst [vmem:[#allocation3 + $0x1b4] sm:$0xf] %v1090_v17 }
  0xb9   : > { %1144 = vst [vmem:[#allocation3 + $0x1c8] sm:$0xf] %v1094_v13 }
  0xba   : > { %1145 = vst [vmem:[#allocation3 + $0x1dc] sm:$0xf] %v1097_v51 }
  0xbb PF: > { %v2591_v56 = vld [vmem:[%s2843_s25 + $0x38] sm:$0xff]  ;;  %v2590_v37 = vld [vmem:[%s2843_s25 + $0x30] sm:$0xff]  ;;  %v2589_v61 = vld [vmem:[%s2843_s25 + $0x28] sm:$0xff]  ;;  %s2543_s6 = smul.u32 40, %s2764_s12  ;;  %p2538_p8 = scmp.ne.s32.totalorder %s2764_s12, 4 }
  0xbc   : > { %2671 = vmatpush.bf16.msra.mxu1 %v2591_v56  ;;  %2672 = vmatpush.bf16.msra.mxu2 %v2591_v56  ;;  %v2588_v40 = vld [vmem:[%s2843_s25 + $0x20] sm:$0xff]  ;;  %v2587_v23 = vld [vmem:[%s2843_s25 + $0x18] sm:$0xff]  ;;  %v2586_v26 = vld [vmem:[%s2843_s25 + $0x10] sm:$0xff] }
  0xbd   : > { %2673 = vmatpush.bf16.msra.mxu3 %v2591_v56  ;;  %1741 = vmatpush.bf16.msra.mxu0 %v2591_v56  ;;  %v2585_v48 = vld [vmem:[%s2843_s25 + $0x8] sm:$0xff]  ;;  %v2584_v21 = vld [vmem:[%s2843_s25] sm:$0xff]  ;;  %s3737_s7 = scalar_lea.vmem [#allocation3], %s2543_s6  ;;  %v2607_v29 = vld [vmem:[%s2843_s25 + $0xb8] sm:$0xff] }
  0xbe   : > { %v2599_v27 = vld [vmem:[%s2843_s25 + $0x78] sm:$0xff]  ;;  %v2606_v7 = vld [vmem:[%s2843_s25 + $0xb0] sm:$0xff]  ;;  %v2605_v59 = vld [vmem:[%s2843_s25 + $0xa8] sm:$0xff] }
  0xbf   : > { %v2615_v47 = vld [vmem:[%s2843_s25 + $0xf8] sm:$0xff]  ;;  %v2598_v30 = vld [vmem:[%s2843_s25 + $0x70] sm:$0xff]  ;;  %v2597_v50 = vld [vmem:[%s2843_s25 + $0x68] sm:$0xff] }
  0xc0   : > { %2674 = vmatpush.bf16.msra.mxu1 %v2590_v37  ;;  %2675 = vmatpush.bf16.msra.mxu2 %v2590_v37  ;;  %v2623_v11 = vld [vmem:[%s2843_s25 + $0x138] sm:$0xff]  ;;  %v2614_v0 = vld [vmem:[%s2843_s25 + $0xf0] sm:$0xff]  ;;  %v2613_v5 = vld [vmem:[%s2843_s25 + $0xe8] sm:$0xff] }
  0xc1   : > { %2676 = vmatpush.bf16.msra.mxu3 %v2590_v37  ;;  %1742 = vmatpush.bf16.msra.mxu0 %v2590_v37  ;;  %v2260_v60 = vld [vmem:[%s3737_s7 + $0x50] sm:$0xf]  ;;  %v2556_v14 = vld [vmem:[%s3737_s7 + $0x60] sm:$0xf0]  ;;  %v2300_v18 = vld [vmem:[%s3737_s7 + $0xa0] sm:$0xf] }
  0xc2   : > { %v2566_v16 = vld [vmem:[%s3737_s7 + $0xb0] sm:$0xf0]  ;;  %v2340_v4 = vld [vmem:[%s3737_s7 + $0xf0] sm:$0xf]  ;;  %v2576_v44 = vld [vmem:[%s3737_s7 + $0x100] sm:$0xf0]  ;;  %v2261_v42 = vor.u32 %v2556_v14, %v2260_v60 }
  0xc3   : > { %v2220_v32 = vld [vmem:[%s3737_s7] sm:$0xf]  ;;  %v2546_v25 = vld [vmem:[%s3737_s7 + $0x10] sm:$0xf0]  ;;  %v2301_v54 = vor.u32 %v2566_v16, %v2300_v18  ;;  %v2341_v43 = vor.u32 %v2576_v44, %v2340_v4  ;;  %v2621_v22 = vld [vmem:[%s2843_s25 + $0x128] sm:$0xff] }
  0xc4   : > { %2677 = vmatpush.bf16.msra.mxu1 %v2589_v61  ;;  %2678 = vmatpush.bf16.msra.mxu2 %v2589_v61  ;;  %v2221_v58 = vor.u32 %v2546_v25, %v2220_v32  ;;  %v2622_v20 = vld [vmem:[%s2843_s25 + $0x130] sm:$0xff]  ;;  %v2604_v62 = vld [vmem:[%s2843_s25 + $0xa0] sm:$0xff]  ;;  %v2280_v39 = vld [vmem:[%s3737_s7 + $0x78] sm:$0xf] }
  0xc5   : > { %2679 = vmatpush.bf16.msra.mxu3 %v2589_v61  ;;  %1743 = vmatpush.bf16.msra.mxu0 %v2589_v61  ;;  %v2596_v53 = vld [vmem:[%s2843_s25 + $0x60] sm:$0xff]  ;;  %v2561_v28 = vld [vmem:[%s3737_s7 + $0x88] sm:$0xf0]  ;;  %v2320_v52 = vld [vmem:[%s3737_s7 + $0xc8] sm:$0xf] }
  0xc6   : > { %v2612_v41 = vld [vmem:[%s2843_s25 + $0xe0] sm:$0xff]  ;;  %v2571_v38 = vld [vmem:[%s3737_s7 + $0xd8] sm:$0xf0]  ;;  %v2360_v57 = vld [vmem:[%s3737_s7 + $0x118] sm:$0xf]  ;;  %v2281_v36 = vor.u32 %v2561_v28, %v2280_v39 }
  0xc7   : > { %v2620_v63 = vld [vmem:[%s2843_s25 + $0x120] sm:$0xff]  ;;  %v2581_v12 = vld [vmem:[%s3737_s7 + $0x128] sm:$0xf0]  ;;  %v2240_v24 = vld [vmem:[%s3737_s7 + $0x28] sm:$0xf]  ;;  %v2321_v31 = vor.u32 %v2571_v38, %v2320_v52 }
  0xc8   : > { %2680 = vmatpush.bf16.msra.mxu1 %v2588_v40  ;;  %2681 = vmatpush.bf16.msra.mxu2 %v2588_v40  ;;  %v2551_v19 = vld [vmem:[%s3737_s7 + $0x38] sm:$0xf0]  ;;  %v2361_v8 = vor.u32 %v2581_v12, %v2360_v57  ;;  %v2602_v15 = vld [vmem:[%s2843_s25 + $0x90] sm:$0xff]  ;;  %v2601_v10 = vld [vmem:[%s2843_s25 + $0x88] sm:$0xff] }
  0xc9   : > { %2682 = vmatpush.bf16.msra.mxu3 %v2588_v40  ;;  %1744 = vmatpush.bf16.msra.mxu0 %v2588_v40  ;;  %v2603_v55 = vld [vmem:[%s2843_s25 + $0x98] sm:$0xff]  ;;  %v2241_v2 = vor.u32 %v2551_v19, %v2240_v24  ;;  %v2594_v33 = vld [vmem:[%s2843_s25 + $0x50] sm:$0xff]  ;;  %v2593_v46 = vld [vmem:[%s2843_s25 + $0x48] sm:$0xff] }
  0xca   : > { %v2595_v1 = vld [vmem:[%s2843_s25 + $0x58] sm:$0xff]  ;;  %v2610_v45 = vld [vmem:[%s2843_s25 + $0xd0] sm:$0xff]  ;;  %v2609_v6 = vld [vmem:[%s2843_s25 + $0xc8] sm:$0xff] }
  0xcb   : > { %v2611_v49 = vld [vmem:[%s2843_s25 + $0xd8] sm:$0xff]  ;;  %v2618_v35 = vld [vmem:[%s2843_s25 + $0x110] sm:$0xff]  ;;  %v2617_v34 = vld [vmem:[%s2843_s25 + $0x108] sm:$0xff] }
  0xcc   : > { %2683 = vmatpush.bf16.msra.mxu1 %v2587_v23  ;;  %2684 = vmatpush.bf16.msra.mxu2 %v2587_v23  ;;  %v2619_v3 = vld [vmem:[%s2843_s25 + $0x118] sm:$0xff]  ;;  %v2600_v9 = vld [vmem:[%s2843_s25 + $0x80] sm:$0xff]  ;;  %v2228_v61 = vld [vmem:[%s3737_s7 + $0x8] sm:$0xf] }
  0xcd   : > { %2685 = vmatpush.bf16.msra.mxu3 %v2587_v23  ;;  %1745 = vmatpush.bf16.msra.mxu0 %v2587_v23  ;;  %v2592_v17 = vld [vmem:[%s2843_s25 + $0x40] sm:$0xff]  ;;  %v2222_v37 = vld [vmem:[%s3737_s7 + $0x14] sm:$0xf0]  ;;  %v2547_v40 = vld [vmem:[%s3737_s7 + $0x18] sm:$0xf0] }
  0xce   : > { %v2608_v13 = vld [vmem:[%s2843_s25 + $0xc0] sm:$0xff]  ;;  %v2545_v23 = vld [vmem:[%s3737_s7 + $0xc] sm:$0xf]  ;;  %v2229_v14 = vor.u32 %v2547_v40, %v2228_v61  ;;  %v2248_v32 = vld [vmem:[%s3737_s7 + $0x30] sm:$0xf] }
  0xcf   : > { %v2616_v51 = vld [vmem:[%s2843_s25 + $0x100] sm:$0xff]  ;;  %v2549_v4 = vld [vmem:[%s3737_s7 + $0x2c] sm:$0xf]  ;;  %v2559_v39 = vld [vmem:[%s3737_s7 + $0x7c] sm:$0xf] }
  0xd0   : > { %2686 = vmatpush.bf16.msra.mxu1 %v2586_v26  ;;  %2687 = vmatpush.bf16.msra.mxu2 %v2586_v26  ;;  %v2544_v56 = vld [vmem:[%s3737_s7 + $0x4] sm:$0xf]  ;;  %v2242_v44 = vld [vmem:[%s3737_s7 + $0x3c] sm:$0xf0]  ;;  %v2282_v28 = vld [vmem:[%s3737_s7 + $0x8c] sm:$0xf0] }
  0xd1   : > { %2688 = vmatpush.bf16.msra.mxu3 %v2586_v26  ;;  %1746 = vmatpush.bf16.msra.mxu0 %v2586_v26  ;;  %v2230_v26 = vld [vmem:[%s3737_s7 + $0x1c] sm:$0xf0]  ;;  %v2225_v60 = vor.u32 %v2544_v56, %v2222_v37  ;;  %v2552_v25 = vld [vmem:[%s3737_s7 + $0x40] sm:$0xf0]  ;;  %v2562_v38 = vld [vmem:[%s3737_s7 + $0x90] sm:$0xf0] }
  0xd2   : > { %v2233_v18 = vor.u32 %v2545_v23, %v2230_v26  ;;  %v2288_v52 = vld [vmem:[%s3737_s7 + $0x80] sm:$0xf]  ;;  %v2560_v57 = vld [vmem:[%s3737_s7 + $0x84] sm:$0xf]  ;;  %v2290_v12 = vld [vmem:[%s3737_s7 + $0x94] sm:$0xf0] }
  0xd3   : > { %v2296_v24 = vld [vmem:[%s3737_s7 + $0x88] sm:$0xf]  ;;  %v2563_v19 = vld [vmem:[%s3737_s7 + $0x98] sm:$0xf0]  ;;  %v2570_v56 = vld [vmem:[%s3737_s7 + $0xd4] sm:$0xf] }
  0xd4   : > { %2689 = vmatpush.bf16.msra.mxu1 %v2585_v48  ;;  %2690 = vmatpush.bf16.msra.mxu2 %v2585_v48  ;;  %v2330_v37 = vld [vmem:[%s3737_s7 + $0xe4] sm:$0xf0]  ;;  %v2336_v61 = vld [vmem:[%s3737_s7 + $0xd8] sm:$0xf]  ;;  %v2573_v40 = vld [vmem:[%s3737_s7 + $0xe8] sm:$0xf0] }
  0xd5   : > { %2691 = vmatpush.bf16.msra.mxu3 %v2585_v48  ;;  %1747 = vmatpush.bf16.msra.mxu0 %v2585_v48  ;;  %v2236_v48 = vld [vmem:[%s3737_s7 + $0x10] sm:$0xf] }
  0xd8   : > { %2692 = vmatpush.bf16.msra.mxu1 %v2584_v21  ;;  %2693 = vmatpush.bf16.msra.mxu2 %v2584_v21 }
  0xd9   : > { %2694 = vmatpush.bf16.msra.mxu3 %v2584_v21  ;;  %1748 = vmatpush.bf16.msra.mxu0 %v2584_v21  ;;  %v2548_v21 = vld [vmem:[%s3737_s7 + $0x20] sm:$0xf0] }
  0xda   : > { %v2237_v16 = vor.u32 %v2548_v21, %v2236_v48  ;;  %v2333_v48 = vor.u32 %v2570_v56, %v2330_v37  ;;  %v2337_v21 = vor.u32 %v2573_v40, %v2336_v61  ;;  %v1198_v40 = vld [vmem:[#allocation2] sm:$0xff] }
  0xdb   : > { %1759 = vmatmul.bf16.vlgmr.msra.gmra.mxu1 %v2261_v42  ;;  %1769 = vmatmul.bf16.vlgmr.msra.gmra.mxu2 %v2301_v54  ;;  %v2256_v42 = vld [vmem:[%s3737_s7 + $0x38] sm:$0xf]  ;;  %v2553_v54 = vld [vmem:[%s3737_s7 + $0x48] sm:$0xf0] }
  0xdc   : > { %1839 = vmatpush.bf16.msrb.mxu2 %v2607_v29  ;;  %1790 = vmatpush.bf16.msrb.mxu1 %v2599_v27  ;;  %v2550_v29 = vld [vmem:[%s3737_s7 + $0x34] sm:$0xf]  ;;  %v2250_v27 = vld [vmem:[%s3737_s7 + $0x44] sm:$0xf0] }
  0xdd   : > { %1779 = vmatmul.bf16.vlgmr.msra.gmra.mxu3 %v2341_v43  ;;  %1749 = vmatmul.bf16.vlgmr.msra.gmra.mxu0 %v2221_v58  ;;  %v2245_v43 = vor.u32 %v2549_v4, %v2242_v44  ;;  %v2249_v58 = vor.u32 %v2552_v25, %v2248_v32  ;;  %v2575_v4 = vld [vmem:[%s3737_s7 + $0xfc] sm:$0xf]  ;;  %v2350_v44 = vld [vmem:[%s3737_s7 + $0x10c] sm:$0xf0]  ;;  %v2356_v32 = vld [vmem:[%s3737_s7 + $0x100] sm:$0xf] }
  0xde   : > { %1888 = vmatpush.bf16.msrb.mxu3 %v2615_v47  ;;  %1937 = vmatpush.bf16.msrb.mxu0 %v2623_v11  ;;  %v2253_v47 = vor.u32 %v2550_v29, %v2250_v27  ;;  %v2257_v11 = vor.u32 %v2553_v54, %v2256_v42  ;;  %v2578_v25 = vld [vmem:[%s3737_s7 + $0x110] sm:$0xf0]  ;;  %v2353_v54 = vor.u32 %v2575_v4, %v2350_v44  ;;  %v1199_v44 = vld [vmem:[#allocation2 + $0x58] sm:$0xff] }
  0xe0   : > { %1840 = vmatpush.bf16.msrb.mxu2 %v2606_v7  ;;  %1791 = vmatpush.bf16.msrb.mxu1 %v2598_v30  ;;  %v2554_v7 = vld [vmem:[%s3737_s7 + $0x54] sm:$0xf]  ;;  %v2262_v30 = vld [vmem:[%s3737_s7 + $0x64] sm:$0xf0] }
  0xe2   : > { %1889 = vmatpush.bf16.msrb.mxu3 %v2614_v0  ;;  %1938 = vmatpush.bf16.msrb.mxu0 %v2622_v20  ;;  %v2268_v0 = vld [vmem:[%s3737_s7 + $0x58] sm:$0xf]  ;;  %v2557_v20 = vld [vmem:[%s3737_s7 + $0x68] sm:$0xf0] }
  0xe4   : > { %1841 = vmatpush.bf16.msrb.mxu2 %v2605_v59  ;;  %1792 = vmatpush.bf16.msrb.mxu1 %v2597_v50  ;;  %v2555_v59 = vld [vmem:[%s3737_s7 + $0x5c] sm:$0xf]  ;;  %v2270_v50 = vld [vmem:[%s3737_s7 + $0x6c] sm:$0xf0] }
  0xe6   : > { %1890 = vmatpush.bf16.msrb.mxu3 %v2613_v5  ;;  %1939 = vmatpush.bf16.msrb.mxu0 %v2621_v22  ;;  %v2276_v5 = vld [vmem:[%s3737_s7 + $0x60] sm:$0xf]  ;;  %v2558_v22 = vld [vmem:[%s3737_s7 + $0x70] sm:$0xf0] }
  0xe8   : > { %1842 = vmatpush.bf16.msrb.mxu2 %v2604_v62  ;;  %1793 = vmatpush.bf16.msrb.mxu1 %v2596_v53  ;;  %v2265_v62 = vor.u32 %v2554_v7, %v2262_v30  ;;  %v2269_v53 = vor.u32 %v2557_v20, %v2268_v0  ;;  %v2579_v0 = vld [vmem:[%s3737_s7 + $0x11c] sm:$0xf]  ;;  %v2362_v20 = vld [vmem:[%s3737_s7 + $0x12c] sm:$0xf0] }
  0xea   : > { %1891 = vmatpush.bf16.msrb.mxu3 %v2612_v41  ;;  %1940 = vmatpush.bf16.msrb.mxu0 %v2620_v63  ;;  %v2273_v41 = vor.u32 %v2555_v59, %v2270_v50  ;;  %v2277_v63 = vor.u32 %v2558_v22, %v2276_v5  ;;  %v2368_v59 = vld [vmem:[%s3737_s7 + $0x120] sm:$0xf]  ;;  %v2582_v50 = vld [vmem:[%s3737_s7 + $0x130] sm:$0xf0]  ;;  %v2580_v5 = vld [vmem:[%s3737_s7 + $0x124] sm:$0xf] }
  0xeb   : > { %1764 = vmatmul.bf16.gmra.mxu1 %v2281_v36  ;;  %1774 = vmatmul.bf16.gmra.mxu2 %v2321_v31  ;;  %v2293_v36 = vor.u32 %v2560_v57, %v2290_v12  ;;  %v2297_v31 = vor.u32 %v2563_v19, %v2296_v24  ;;  %v2370_v22 = vld [vmem:[%s3737_s7 + $0x134] sm:$0xf0] }
  0xec   : > { %1843 = vmatpush.bf16.msrb.mxu2 %v2603_v55  ;;  %1794 = vmatpush.bf16.msrb.mxu1 %v2595_v1  ;;  %v2285_v55 = vor.u32 %v2559_v39, %v2282_v28  ;;  %v2289_v1 = vor.u32 %v2562_v38, %v2288_v52  ;;  %v2365_v39 = vor.u32 %v2579_v0, %v2362_v20  ;;  %v1200_v20 = vld [vmem:[#allocation2 + $0x18] sm:$0xff] }
  0xed   : > { %1784 = vmatmul.bf16.gmra.mxu3 %v2361_v8  ;;  %1754 = vmatmul.bf16.gmra.mxu0 %v2241_v2  ;;  %v2564_v8 = vld [vmem:[%s3737_s7 + $0xa4] sm:$0xf]  ;;  %v2302_v2 = vld [vmem:[%s3737_s7 + $0xb4] sm:$0xf0]  ;;  %v2369_v28 = vor.u32 %v2582_v50, %v2368_v59  ;;  %v2373_v38 = vor.u32 %v2580_v5, %v2370_v22 }
  0xee   : > { %1892 = vmatpush.bf16.msrb.mxu3 %v2611_v49  ;;  %1941 = vmatpush.bf16.msrb.mxu0 %v2619_v3  ;;  %v2308_v49 = vld [vmem:[%s3737_s7 + $0xa8] sm:$0xf]  ;;  %v2567_v3 = vld [vmem:[%s3737_s7 + $0xb8] sm:$0xf0] }
  0xf0   : > { %1844 = vmatpush.bf16.msrb.mxu2 %v2602_v15  ;;  %1795 = vmatpush.bf16.msrb.mxu1 %v2594_v33  ;;  %v2565_v15 = vld [vmem:[%s3737_s7 + $0xac] sm:$0xf]  ;;  %v2310_v33 = vld [vmem:[%s3737_s7 + $0xbc] sm:$0xf0] }
  0xf2   : > { %1893 = vmatpush.bf16.msrb.mxu3 %v2610_v45  ;;  %1942 = vmatpush.bf16.msrb.mxu0 %v2618_v35  ;;  %v2316_v45 = vld [vmem:[%s3737_s7 + $0xb0] sm:$0xf]  ;;  %v2568_v35 = vld [vmem:[%s3737_s7 + $0xc0] sm:$0xf0] }
  0xf4   : > { %1845 = vmatpush.bf16.msrb.mxu2 %v2601_v10  ;;  %1796 = vmatpush.bf16.msrb.mxu1 %v2593_v46  ;;  %v2305_v10 = vor.u32 %v2564_v8, %v2302_v2  ;;  %v2309_v46 = vor.u32 %v2567_v3, %v2308_v49 }
  0xf6   : > { %1894 = vmatpush.bf16.msrb.mxu3 %v2609_v6  ;;  %1943 = vmatpush.bf16.msrb.mxu0 %v2617_v34  ;;  %v2313_v6 = vor.u32 %v2565_v15, %v2310_v33  ;;  %v2317_v34 = vor.u32 %v2568_v35, %v2316_v45 }
  0xf8   : > { %1846 = vmatpush.bf16.msrb.mxu2 %v2600_v9  ;;  %1797 = vmatpush.bf16.msrb.mxu1 %v2592_v17  ;;  %v2569_v9 = vld [vmem:[%s3737_s7 + $0xcc] sm:$0xf]  ;;  %v2322_v17 = vld [vmem:[%s3737_s7 + $0xdc] sm:$0xf0] }
  0xf9   : > { %v2325_v23 = vor.u32 %v2569_v9, %v2322_v17 }
  0xfa   : > { %1895 = vmatpush.bf16.msrb.mxu3 %v2608_v13  ;;  %1944 = vmatpush.bf16.msrb.mxu0 %v2616_v51  ;;  %v2328_v13 = vld [vmem:[%s3737_s7 + $0xd0] sm:$0xf]  ;;  %v2572_v51 = vld [vmem:[%s3737_s7 + $0xe0] sm:$0xf0] }
  0xfb   : > { %1798 = vmatmul.bf16.vlgmr.msrb.gmra.mxu1 %v2225_v60  ;;  %1847 = vmatmul.bf16.vlgmr.msrb.gmra.mxu2 %v2229_v14  ;;  %v2329_v26 = vor.u32 %v2572_v51, %v2328_v13  ;;  %v2574_v60 = vld [vmem:[%s3737_s7 + $0xf4] sm:$0xf]  ;;  %v2342_v14 = vld [vmem:[%s3737_s7 + $0x104] sm:$0xf0] }
  0xfc   : > { %v2345_v29 = vor.u32 %v2574_v60, %v2342_v14 }
  0xfd   : > { %1896 = vmatmul.bf16.vlgmr.msrb.gmra.mxu3 %v2233_v18  ;;  %1945 = vmatmul.bf16.vlgmr.msrb.gmra.mxu0 %v2237_v16  ;;  %v2348_v18 = vld [vmem:[%s3737_s7 + $0xf8] sm:$0xf]  ;;  %v2577_v16 = vld [vmem:[%s3737_s7 + $0x108] sm:$0xf0] }
  0xfe   : > { %v2349_v27 = vor.u32 %v2577_v16, %v2348_v18 }
 0x10b   : > { %1803 = vmatmul.bf16.gmra.mxu1 %v2245_v43  ;;  %1852 = vmatmul.bf16.gmra.mxu2 %v2249_v58  ;;  %v2357_v43 = vor.u32 %v2578_v25, %v2356_v32 }
 0x10d   : > { %1901 = vmatmul.bf16.gmra.mxu3 %v2253_v47  ;;  %1950 = vmatmul.bf16.gmra.mxu0 %v2257_v11 }
 0x11b   : > { %1808 = vmatmul.bf16.gmra.mxu1 %v2265_v62  ;;  %1857 = vmatmul.bf16.gmra.mxu2 %v2269_v53  ;;  %v2376_v62 = vld [vmem:[%s3737_s7 + $0x128] sm:$0xf]  ;;  %v2583_v53 = vld [vmem:[%s3737_s7 + $0x138] sm:$0xf0] }
 0x11c   : > { %v2377_v57 = vor.u32 %v2583_v53, %v2376_v62 }
 0x11d   : > { %1906 = vmatmul.bf16.gmra.mxu3 %v2273_v41  ;;  %1955 = vmatmul.bf16.gmra.mxu0 %v2277_v63 }
 0x12b   : > { %1813 = vmatmul.bf16.gmra.mxu1 %v2285_v55  ;;  %1862 = vmatmul.bf16.gmra.mxu2 %v2289_v1 }
 0x12d   : > { %1911 = vmatmul.bf16.gmra.mxu3 %v2293_v36  ;;  %1960 = vmatmul.bf16.gmra.mxu0 %v2297_v31 }
 0x13b   : > { %1818 = vmatmul.bf16.gmra.mxu1 %v2305_v10  ;;  %1867 = vmatmul.bf16.gmra.mxu2 %v2309_v46  ;;  %v1197_v46 = vld [vmem:[#allocation2 + $0x30] sm:$0xff] }
 0x13d   : > { %1916 = vmatmul.bf16.gmra.mxu3 %v2313_v6  ;;  %1965 = vmatmul.bf16.gmra.mxu0 %v2317_v34 }
 0x14b   : > { %1823 = vmatmul.bf16.gmra.mxu1 %v2325_v23  ;;  %1872 = vmatmul.bf16.gmra.mxu2 %v2329_v26 }
 0x14d   : > { %1921 = vmatmul.bf16.gmra.mxu3 %v2333_v48  ;;  %1970 = vmatmul.bf16.gmra.mxu0 %v2337_v21 }
 0x158   : > { %v3843_v42 = vpop.f32.mrf.mxu1 }
 0x15a   : > { %v1750_v58 = vpop.f32.mrf.mxu0 }
 0x15b   : > { %1828 = vmatmul.bf16.gmra.mxu1 %v2345_v29  ;;  %1877 = vmatmul.bf16.gmra.mxu2 %v2349_v27 }
 0x15d   : > { %1926 = vmatmul.bf16.gmra.mxu3 %v2353_v54  ;;  %1975 = vmatmul.bf16.gmra.mxu0 %v2357_v43 }
 0x15e   : > { %v3845_v47 = vpop.f32.mrf.mxu2 }
 0x160   : > { %v3847_v11 = vpop.f32.mrf.mxu3  ;;  %v3849_v7 = vpop.f32.mrf.mxu1 }
 0x162   : > { %v1752_v30 = vpop.f32.mrf.mxu0 }
 0x166   : > { %v3859_v41 = vpop.f32.mrf.mxu2 }
 0x168   : > { %v3861_v63 = vpop.f32.mrf.mxu3  ;;  %v3863_v52 = vpop.f32.mrf.mxu1 }
 0x16a   : > { %v1755_v12 = vpop.f32.mrf.mxu0 }
 0x16b   : > { %1833 = vmatmul.bf16.gmra.mxu1 %v2365_v39  ;;  %1882 = vmatmul.bf16.gmra.mxu2 %v2369_v28 }
 0x16d   : > { %1931 = vmatmul.bf16.gmra.mxu3 %v2373_v38  ;;  %1980 = vmatmul.bf16.gmra.mxu0 %v2377_v57  ;;  %v1201_v57 = vld [vmem:[#allocation2 + $0x50] sm:$0xff] }
 0x16e   : > { %v3865_v24 = vpop.f32.mrf.mxu2 }
 0x170   : > { %v3867_v19 = vpop.f32.mrf.mxu3  ;;  %v3869_v55 = vpop.f32.mrf.mxu1 }
 0x172   : > { %v1757_v1 = vpop.f32.mrf.mxu0 }
 0x176   : > { %v3871_v36 = vpop.f32.mrf.mxu2 }
 0x178   : > { %v3873_v31 = vpop.f32.mrf.mxu3  ;;  %v1799_v8 = vpop.f32.mrf.mxu1 }
 0x179   : > { %v1800_v49 = vadd.f32 %v1799_v8, %v1750_v58 }
 0x17a   : > { %v1946_v2 = vpop.f32.mrf.mxu0 }
 0x17e   : > { %v1848_v3 = vpop.f32.mrf.mxu2 }
 0x17f   : > { %v1849_v15 = vadd.f32 %v1848_v3, %v1800_v49 }
 0x180   : > { %v1897_v33 = vpop.f32.mrf.mxu3  ;;  %v1801_v45 = vpop.f32.mrf.mxu1 }
 0x181   : > { %v1898_v35 = vadd.f32 %v1897_v33, %v1849_v15  ;;  %v1802_v9 = vadd.f32 %v1801_v45, %v1752_v30 }
 0x182   : > { %v1948_v10 = vpop.f32.mrf.mxu0 }
 0x183   : > { %v1947_v6 = vadd.f32 %v1946_v2, %v1898_v35 }
 0x185   : > { %v1986_v34 = vadd.f32 %v1947_v6, %v1197_v46 }
 0x186   : > { %v1850_v17 = vpop.f32.mrf.mxu2 }
 0x187   : > { %2002 = vst [vmem:[#allocation2 + $0x30] sm:$0xff] %v1986_v34  ;;  %v1851_v13 = vadd.f32 %v1850_v17, %v1802_v9 }
 0x188   : > { %v1899_v51 = vpop.f32.mrf.mxu3  ;;  %v1804_v56 = vpop.f32.mrf.mxu1 }
 0x189   : > { %v1900_v37 = vadd.f32 %v1899_v51, %v1851_v13  ;;  %v1805_v48 = vadd.f32 %v1804_v56, %v1755_v12 }
 0x18a   : > { %v1951_v61 = vpop.f32.mrf.mxu0 }
 0x18b   : > { %v1949_v23 = vadd.f32 %v1948_v10, %v1900_v37 }
 0x18d   : > { %v1987_v26 = vadd.f32 %v1949_v23, %v1198_v40 }
 0x18e   : > { %v1853_v21 = vpop.f32.mrf.mxu2 }
 0x18f   : > { %2003 = vst [vmem:[#allocation2] sm:$0xff] %v1987_v26  ;;  %v1854_v60 = vadd.f32 %v1853_v21, %v1805_v48 }
 0x190   : > { %v1902_v14 = vpop.f32.mrf.mxu3  ;;  %v1806_v18 = vpop.f32.mrf.mxu1 }
 0x191   : > { %v1903_v16 = vadd.f32 %v1902_v14, %v1854_v60  ;;  %v1807_v29 = vadd.f32 %v1806_v18, %v1757_v1 }
 0x192   : > { %v1953_v4 = vpop.f32.mrf.mxu0 }
 0x193   : > { %v1952_v32 = vadd.f32 %v1951_v61, %v1903_v16 }
 0x195   : > { %v1988_v25 = vadd.f32 %v1952_v32, %v1199_v44 }
 0x196   : > { %v1855_v27 = vpop.f32.mrf.mxu2 }
 0x197   : > { %2004 = vst [vmem:[#allocation2 + $0x58] sm:$0xff] %v1988_v25  ;;  %v1856_v54 = vadd.f32 %v1855_v27, %v1807_v29 }
 0x198   : > { %v1904_v43 = vpop.f32.mrf.mxu3  ;;  %v1809_v58 = vpop.f32.mrf.mxu1 }
 0x199   : > { %v1905_v30 = vadd.f32 %v1904_v43, %v1856_v54  ;;  %v1810_v5 = vadd.f32 %v1809_v58, %v3843_v42  ;;  %v1202_v42 = vld [vmem:[#allocation2 + $0x68] sm:$0xff] }
 0x19a   : > { %v1956_v0 = vpop.f32.mrf.mxu0 }
 0x19b   : > { %v1954_v59 = vadd.f32 %v1953_v4, %v1905_v30 }
 0x19d   : > { %v1989_v50 = vadd.f32 %v1954_v59, %v1200_v20 }
 0x19e   : > { %v1858_v22 = vpop.f32.mrf.mxu2 }
 0x19f   : > { %2005 = vst [vmem:[#allocation2 + $0x18] sm:$0xff] %v1989_v50  ;;  %v1859_v62 = vadd.f32 %v1858_v22, %v1810_v5 }
 0x1a0   : > { %v1907_v53 = vpop.f32.mrf.mxu3  ;;  %v1811_v39 = vpop.f32.mrf.mxu1 }
 0x1a1   : > { %v1908_v28 = vadd.f32 %v1907_v53, %v1859_v62  ;;  %v1812_v8 = vadd.f32 %v1811_v39, %v3849_v7  ;;  %v1203_v7 = vld [vmem:[#allocation2 + $0x8] sm:$0xff] }
 0x1a2   : > { %v1958_v38 = vpop.f32.mrf.mxu0 }
 0x1a3   : > { %v1957_v12 = vadd.f32 %v1956_v0, %v1908_v28 }
 0x1a5   : > { %v1990_v1 = vadd.f32 %v1957_v12, %v1201_v57 }
 0x1a6   : > { %v1860_v2 = vpop.f32.mrf.mxu2 }
 0x1a7   : > { %2006 = vst [vmem:[#allocation2 + $0x50] sm:$0xff] %v1990_v1  ;;  %v1861_v49 = vadd.f32 %v1860_v2, %v1812_v8  ;;  %v1207_v1 = vld [vmem:[#allocation2 + $0x10] sm:$0xff] }
 0x1a8   : > { %v1909_v3 = vpop.f32.mrf.mxu3  ;;  %v1814_v15 = vpop.f32.mrf.mxu1 }
 0x1a9   : > { %v1910_v33 = vadd.f32 %v1909_v3, %v1861_v49  ;;  %v1815_v46 = vadd.f32 %v1814_v15, %v3863_v52  ;;  %v1204_v52 = vld [vmem:[#allocation2 + $0x48] sm:$0xff] }
 0x1aa   : > { %v1961_v45 = vpop.f32.mrf.mxu0 }
 0x1ab   : > { %v1959_v35 = vadd.f32 %v1958_v38, %v1910_v33 }
 0x1ad   : > { %v1991_v10 = vadd.f32 %v1959_v35, %v1202_v42  ;;  %v1208_v35 = vld [vmem:[#allocation2 + $0x38] sm:$0xff] }
 0x1ae   : > { %v1863_v6 = vpop.f32.mrf.mxu2 }
 0x1af   : > { %2007 = vst [vmem:[#allocation2 + $0x68] sm:$0xff] %v1991_v10  ;;  %v1864_v34 = vadd.f32 %v1863_v6, %v1815_v46 }
 0x1b0   : > { %v1912_v9 = vpop.f32.mrf.mxu3  ;;  %v1816_v17 = vpop.f32.mrf.mxu1 }
 0x1b1   : > { %v1913_v13 = vadd.f32 %v1912_v9, %v1864_v34  ;;  %v1817_v61 = vadd.f32 %v1816_v17, %v3869_v55  ;;  %v1205_v55 = vld [vmem:[#allocation2 + $0x40] sm:$0xff] }
 0x1b2   : > { %v1963_v51 = vpop.f32.mrf.mxu0 }
 0x1b3   : > { %v1962_v56 = vadd.f32 %v1961_v45, %v1913_v13 }
 0x1b5   : > { %v1992_v37 = vadd.f32 %v1962_v56, %v1203_v7  ;;  %v1209_v7 = vld [vmem:[#allocation2 + $0x60] sm:$0xff] }
 0x1b6   : > { %v1865_v40 = vpop.f32.mrf.mxu2 }
 0x1b7   : > { %2008 = vst [vmem:[#allocation2 + $0x8] sm:$0xff] %v1992_v37  ;;  %v1866_v23 = vadd.f32 %v1865_v40, %v1817_v61 }
 0x1b8   : > { %v1914_v26 = vpop.f32.mrf.mxu3  ;;  %v1819_v48 = vpop.f32.mrf.mxu1 }
 0x1b9   : > { %v1915_v21 = vadd.f32 %v1914_v26, %v1866_v23  ;;  %v1820_v16 = vadd.f32 %v1819_v48, %v3845_v47  ;;  %v1206_v47 = vld [vmem:[#allocation2 + $0x20] sm:$0xff] }
 0x1ba   : > { %v1966_v60 = vpop.f32.mrf.mxu0 }
 0x1bb   : > { %v1964_v14 = vadd.f32 %v1963_v51, %v1915_v21 }
 0x1bd   : > { %v1993_v18 = vadd.f32 %v1964_v14, %v1204_v52 }
 0x1be   : > { %v1868_v4 = vpop.f32.mrf.mxu2 }
 0x1bf   : > { %2009 = vst [vmem:[#allocation2 + $0x48] sm:$0xff] %v1993_v18  ;;  %v1869_v44 = vadd.f32 %v1868_v4, %v1820_v16 }
 0x1c0   : > { %v1917_v32 = vpop.f32.mrf.mxu3  ;;  %v1821_v25 = vpop.f32.mrf.mxu1 }
 0x1c1   : > { %v1918_v29 = vadd.f32 %v1917_v32, %v1869_v44  ;;  %v1822_v58 = vadd.f32 %v1821_v25, %v3859_v41  ;;  %v1211_v25 = vld [vmem:[#allocation2 + $0x78] sm:$0xff] }
 0x1c2   : > { %v1968_v27 = vpop.f32.mrf.mxu0 }
 0x1c3   : > { %v1967_v54 = vadd.f32 %v1966_v60, %v1918_v29  ;;  %v1210_v60 = vld [vmem:[#allocation2 + $0x70] sm:$0xff] }
 0x1c5   : > { %v1994_v43 = vadd.f32 %v1967_v54, %v1205_v55 }
 0x1c6   : > { %v1870_v30 = vpop.f32.mrf.mxu2 }
 0x1c7   : > { %2010 = vst [vmem:[#allocation2 + $0x40] sm:$0xff] %v1994_v43  ;;  %v1871_v0 = vadd.f32 %v1870_v30, %v1822_v58 }
 0x1c8   : > { %v1919_v20 = vpop.f32.mrf.mxu3  ;;  %v1824_v59 = vpop.f32.mrf.mxu1 }
 0x1c9   : > { %v1920_v50 = vadd.f32 %v1919_v20, %v1871_v0  ;;  %v1825_v53 = vadd.f32 %v1824_v59, %v3865_v24  ;;  %v1212_v20 = vld [vmem:[#allocation2 + $0x28] sm:$0xff] }
 0x1ca   : > { %v1971_v5 = vpop.f32.mrf.mxu0 }
 0x1cb   : > { %v1969_v22 = vadd.f32 %v1968_v27, %v1920_v50 }
 0x1cd   : > { %v1995_v62 = vadd.f32 %v1969_v22, %v1206_v47 }
 0x1ce   : > { %v1873_v39 = vpop.f32.mrf.mxu2 }
 0x1cf   : > { %2011 = vst [vmem:[#allocation2 + $0x20] sm:$0xff] %v1995_v62  ;;  %v1874_v28 = vadd.f32 %v1873_v39, %v1825_v53 }
 0x1d0   : > { %v1922_v38 = vpop.f32.mrf.mxu3  ;;  %v1826_v57 = vpop.f32.mrf.mxu1 }
 0x1d1   : > { %v1923_v12 = vadd.f32 %v1922_v38, %v1874_v28  ;;  %v1827_v49 = vadd.f32 %v1826_v57, %v3871_v36 }
 0x1d2   : > { %v1973_v41 = vpop.f32.mrf.mxu0 }
 0x1d3   : > { %v1972_v8 = vadd.f32 %v1971_v5, %v1923_v12 }
 0x1d5   : > { %v1996_v2 = vadd.f32 %v1972_v8, %v1207_v1 }
 0x1d6   : > { %v1875_v3 = vpop.f32.mrf.mxu2 }
 0x1d7   : > { %2012 = vst [vmem:[#allocation2 + $0x10] sm:$0xff] %v1996_v2  ;;  %v1876_v15 = vadd.f32 %v1875_v3, %v1827_v49 }
 0x1d8   : > { %v1924_v33 = vpop.f32.mrf.mxu3  ;;  %v1829_v45 = vpop.f32.mrf.mxu1 }
 0x1d9   : > { %v1925_v42 = vadd.f32 %v1924_v33, %v1876_v15  ;;  %v1830_v6 = vadd.f32 %v1829_v45, %v3847_v11 }
 0x1da   : > { %v1976_v10 = vpop.f32.mrf.mxu0 }
 0x1db   : > { %v1974_v24 = vadd.f32 %v1973_v41, %v1925_v42 }
 0x1dd   : > { %v1997_v46 = vadd.f32 %v1974_v24, %v1208_v35 }
 0x1de   : > { %v1878_v34 = vpop.f32.mrf.mxu2 }
 0x1df   : > { %2013 = vst [vmem:[#allocation2 + $0x38] sm:$0xff] %v1997_v46  ;;  %v1879_v9 = vadd.f32 %v1878_v34, %v1830_v6 }
 0x1e0   : > { %v1927_v17 = vpop.f32.mrf.mxu3  ;;  %v1831_v13 = vpop.f32.mrf.mxu1 }
 0x1e1   : > { %v1928_v51 = vadd.f32 %v1927_v17, %v1879_v9  ;;  %v1832_v37 = vadd.f32 %v1831_v13, %v3861_v63 }
 0x1e2   : > { %v1978_v61 = vpop.f32.mrf.mxu0 }
 0x1e3   : > { %v1977_v36 = vadd.f32 %v1976_v10, %v1928_v51 }
 0x1e5   : > { %v1998_v56 = vadd.f32 %v1977_v36, %v1209_v7 }
 0x1e6   : > { %v1880_v40 = vpop.f32.mrf.mxu2 }
 0x1e7   : > { %2014 = vst [vmem:[#allocation2 + $0x60] sm:$0xff] %v1998_v56  ;;  %v1881_v23 = vadd.f32 %v1880_v40, %v1832_v37 }
 0x1e8   : > { %v1929_v26 = vpop.f32.mrf.mxu3  ;;  %v1834_v48 = vpop.f32.mrf.mxu1 }
 0x1e9   : > { %v1930_v21 = vadd.f32 %v1929_v26, %v1881_v23  ;;  %v1835_v14 = vadd.f32 %v1834_v48, %v3867_v19 }
 0x1ea   : > { %v1981_v44 = vpop.f32.mrf.mxu0 }
 0x1eb   : > { %v1979_v11 = vadd.f32 %v1978_v61, %v1930_v21 }
 0x1ed   : > { %v1999_v52 = vadd.f32 %v1979_v11, %v1210_v60 }
 0x1ee   : > { %v1883_v18 = vpop.f32.mrf.mxu2 }
 0x1ef   : > { %2015 = vst [vmem:[#allocation2 + $0x70] sm:$0xff] %v1999_v52  ;;  %v1884_v16 = vadd.f32 %v1883_v18, %v1835_v14 }
 0x1f0   : > { %v1932_v4 = vpop.f32.mrf.mxu3  ;;  %v1836_v63 = vpop.f32.mrf.mxu1 }
 0x1f1   : > { %v1933_v32 = vadd.f32 %v1932_v4, %v1884_v16  ;;  %v1837_v55 = vadd.f32 %v1836_v63, %v3873_v31 }
 0x1f2   : > { %v1983_v0 = vpop.f32.mrf.mxu0 }
 0x1f3   : > { %v1982_v29 = vadd.f32 %v1981_v44, %v1933_v32 }
 0x1f5   : > { %v2000_v27 = vadd.f32 %v1982_v29, %v1211_v25 }
 0x1f6   : > { %v1885_v54 = vpop.f32.mrf.mxu2 }
 0x1f7   : > { %2016 = vst [vmem:[#allocation2 + $0x78] sm:$0xff] %v2000_v27  ;;  %v1886_v43 = vadd.f32 %v1885_v54, %v1837_v55 }
 0x1f8   : > { %v1934_v58 = vpop.f32.mrf.mxu3 }
 0x1f9   : > { %v1935_v30 = vadd.f32 %v1934_v58, %v1886_v43 }
 0x1fb   : > { %v1984_v19 = vadd.f32 %v1983_v0, %v1935_v30  ;;  %2021 = sbr.rel (%p2538_p8) target bundleno = 528 (0x210), region = 40 }
 0x1fd   : > { %v2001_v59 = vadd.f32 %v1984_v19, %v1212_v20 }
 0x1ff   : > { %2017 = vst [vmem:[#allocation2 + $0x28] sm:$0xff] %v2001_v59 }
 0x200   : > { %v2022_v50 = vld [vmem:[#allocation2 + $0x30] sm:$0xff]  ;;  %v2023_v5 = vld [vmem:[#allocation2] sm:$0xff]  ;;  %v2024_v31 = vld [vmem:[#allocation2 + $0x58] sm:$0xff] }
 0x201   : > { %v2741_v47 = vld [vmem:[%s3916_s2] ss:$0 sm:$0xff]  ;;  %v2025_v22 = vld [vmem:[#allocation2 + $0x18] sm:$0xff]  ;;  %v2026_v62 = vld [vmem:[#allocation2 + $0x50] sm:$0xff] }
 0x202   : > { %v2027_v53 = vld [vmem:[#allocation2 + $0x68] sm:$0xff]  ;;  %v2042_v28 = vadd.f32 %v2741_v47, %v2022_v50  ;;  %v2043_v38 = vadd.f32 %v2741_v47, %v2023_v5  ;;  %v2044_v57 = vadd.f32 %v2741_v47, %v2024_v31  ;;  %v2045_v12 = vadd.f32 %v2741_v47, %v2025_v22  ;;  %v2030_v3 = vld [vmem:[#allocation2 + $0x40] sm:$0xff]  ;;  %v2032_v24 = vld [vmem:[#allocation2 + $0x10] sm:$0xff] }
 0x203   : > { %v2028_v39 = vld [vmem:[#allocation2 + $0x8] sm:$0xff]  ;;  %v2046_v41 = vadd.f32 %v2741_v47, %v2026_v62  ;;  %v2047_v8 = vadd.f32 %v2741_v47, %v2027_v53  ;;  %v2031_v15 = vld [vmem:[#allocation2 + $0x20] sm:$0xff]  ;;  %v2033_v10 = vld [vmem:[#allocation2 + $0x38] sm:$0xff]  ;;  %v2050_v36 = vadd.f32 %v2741_v47, %v2030_v3  ;;  %v2052_v26 = vadd.f32 %v2741_v47, %v2032_v24 }
 0x204   : > { %v2029_v1 = vld [vmem:[#allocation2 + $0x48] sm:$0xff]  ;;  %v2048_v2 = vadd.f32 %v2741_v47, %v2028_v39  ;;  %v2058_v33 = vmax.f32 %v2042_v28, 0.0  ;;  %v2059_v45 = vmax.f32 %v2043_v38, 0.0  ;;  %v2060_v42 = vmax.f32 %v2044_v57, 0.0  ;;  %v2034_v17 = vld [vmem:[#allocation2 + $0x60] sm:$0xff]  ;;  %v2035_v13 = vld [vmem:[#allocation2 + $0x70] sm:$0xff] }
 0x205   : > { %v2049_v49 = vadd.f32 %v2741_v47, %v2029_v1  ;;  %v2061_v35 = vmax.f32 %v2045_v12, 0.0  ;;  %v2062_v46 = vmax.f32 %v2046_v41, 0.0  ;;  %v2063_v6 = vmax.f32 %v2047_v8, 0.0  ;;  %v2036_v37 = vld [vmem:[#allocation2 + $0x78] sm:$0xff] }
 0x206   : > { %v2064_v34 = vmax.f32 %v2048_v2, 0.0  ;;  %v2627_v51 = vpack.c.bf16 %v2059_v45, %v2058_v33  ;;  %v2051_v56 = vadd.f32 %v2741_v47, %v2031_v15  ;;  %v2037_v61 = vld [vmem:[#allocation2 + $0x28] sm:$0xff]  ;;  %v2053_v48 = vadd.f32 %v2741_v47, %v2033_v10 }
 0x207   : > { %v2065_v9 = vmax.f32 %v2049_v49, 0.0  ;;  %v2632_v7 = vpack.c.bf16 %v2061_v35, %v2060_v42  ;;  %v2637_v40 = vpack.c.bf16 %v2063_v6, %v2062_v46  ;;  %v2066_v21 = vmax.f32 %v2050_v36, 0.0 }
 0x208   : > { %2628 = vst [vmem:[%s2848_s28] sm:$0xff] %v2627_v51   ;;  %v2067_v60 = vmax.f32 %v2051_v56, 0.0  ;;  %v2054_v11 = vadd.f32 %v2741_v47, %v2034_v17  ;;  %v2055_v52 = vadd.f32 %v2741_v47, %v2035_v13  ;;  %v2068_v14 = vmax.f32 %v2052_v26, 0.0 }
 0x209   : > { %v2642_v23 = vpack.c.bf16 %v2065_v9, %v2064_v34  ;;  %2664 = vst [vmem:[%s2848_s28 + $0x8] sm:$0xff] %v2632_v7   ;;  %v2069_v18 = vmax.f32 %v2053_v48, 0.0  ;;  %v2056_v16 = vadd.f32 %v2741_v47, %v2036_v37  ;;  %v2057_v4 = vadd.f32 %v2741_v47, %v2037_v61 }
 0x20a   : > { %2665 = vst [vmem:[%s2848_s28 + $0x10] sm:$0xff] %v2637_v40   ;;  %v2647_v44 = vpack.c.bf16 %v2067_v60, %v2066_v21  ;;  %v2070_v32 = vmax.f32 %v2054_v11, 0.0  ;;  %v2071_v25 = vmax.f32 %v2055_v52, 0.0 }
 0x20b   : > { %2666 = vst [vmem:[%s2848_s28 + $0x18] sm:$0xff] %v2642_v23   ;;  %v2652_v63 = vpack.c.bf16 %v2069_v18, %v2068_v14  ;;  %v2072_v29 = vmax.f32 %v2056_v16, 0.0  ;;  %v2073_v27 = vmax.f32 %v2057_v4, 0.0 }
 0x20c   : > { %2667 = vst [vmem:[%s2848_s28 + $0x20] sm:$0xff] %v2647_v44   ;;  %v2657_v55 = vpack.c.bf16 %v2071_v25, %v2070_v32 }
 0x20d   : > { %2668 = vst [vmem:[%s2848_s28 + $0x28] sm:$0xff] %v2652_v63   ;;  %v2662_v54 = vpack.c.bf16 %v2073_v27, %v2072_v29 }
 0x20e   : > { %2669 = vst [vmem:[%s2848_s28 + $0x30] sm:$0xff] %v2657_v55  }
 0x20f   : > { %2670 = vst [vmem:[%s2848_s28 + $0x38] sm:$0xff] %v2662_v54  }
 0x210 PF: > { %s13_s16 = sadd.s32 1, %s2780_s16   ;;  %s4077_s12 = smov %s2772_s14 }
 0x211   : > { %p10_p9 = scmp.ge.s32.totalorder %s13_s16, 12   ;;  %s4078_s13 = smov %s2776_s15 }
 0x212   : > { %s4079_s14 = smov %s4082_s17  ;;  %s4080_s15 = smov %s4086_s18 }
 0x213   :  { %12 = sbr.rel (!%p10_p9) target bundleno = 3 (0x3), region = 72 }

// kernel: _lambda_.5
= control target key start
LH: loop header
LB: loop body
LE: loop exit
PB: predicated region body
PF: predicated region fallthrough
CT: control target
= control target key end

     0   :  { %s945_s0 = inlined_call_operand.vmem [shape: bf16[16,1024], index: 0, kind: input, shape index: {}]   ;;  %s946_s1 = inlined_call_operand.vmem [shape: bf16[16,1024], index: 1, kind: input, shape index: {}]   ;;  %s947_s2 = inlined_call_operand.vmem [shape: f32[16,32], index: 2, kind: input, shape index: {}]   ;;  %s948_s3 = inlined_call_operand.vmem [shape: f32[16,1], index: 3, kind: input, shape index: {}]   ;;  %s949_s4 = inlined_call_operand.vmem [shape: f32[1,16], index: 4, kind: input, shape index: {}]   ;;  %s950_s5 = inlined_call_operand.<no memory space> [shape: f32[1,1], index: 5, kind: input, shape index: {}]   ;;  %s951_s6 = inlined_call_operand.vmem [shape: f32[1,1024], index: 6, kind: output, shape index: {}]  }
   0x1   :  { %v11_v0 = vstv %s950_s5 }
   0x2   :  { %12 = vst [vmem:[#allocation2] sm:$0x1] %v11_v0 }
   0x3   :  { %s857_s23 = smov 0   ;;  %s859_s24 = smov 0  }
   0x4   :  { %s861_s25 = smov 0  }
   0x5 LB: > { %s697_s5 = sadd.s32 4294967295, %s816_s25   ;;  %s874_s26 = sadd.s32 1, %s816_s25   ;;  %s816_s25 = sphi %s861_s25, %s955_s25   ;;  %s812_s24 = sphi %s859_s24, %s954_s24   ;;  %s808_s23 = sphi %s857_s23, %s953_s23  }
   0x6   : > { %s22_s27 = ssub.s32 %s816_s25, %s874_s26  ;;  %s25_s28 = sadd.s32 1, %s812_s24 }
   0x7   : > { %p23_p0 = scmp.eq.s32.totalorder %s22_s27, 0  ;;  %p32_p1 = scmp.ne.s32.totalorder %s812_s24, %s808_s23 }
   0x8   : > { %p33_p2 = scmp.eq.s32.totalorder %s816_s25, 0  ;;  %p700_p4 = scmp.ge.s32.totalorder %s816_s25, 2 }
   0x9   : > { %s883_s29 = scalar_select %p23_p0, %s812_s24, %s25_s28  }
   0xa   : > { %p885_p3 = por %p33_p2, %p32_p1  ;;  %206 = sbr.rel (%p700_p4) target bundleno = 31 (0x1f), region = 32 }
   0xf   : > { %209 = sbr.rel (!%p885_p3) target bundleno = 23 (0x17), region = 36  ;;  %s211_s7 = sand.u32 (%p885_p3), 1, %s812_s24  }
  0x10   : > { %s757_s8 = sshll.u32 (%p885_p3), %s816_s25, 4  ;;  %s701_s9 = sshll.u32 (%p885_p3), %s211_s7, 5 }
  0x11   : > { %s216_s12 = scalar_lea.vmem (%p885_p3), %s945_s0, %s757_s8  ;;  %s213_s13 = scalar_lea.vmem (%p885_p3), [#allocation3], %s701_s9 }
  0x12   : > { %v229_v1 = vld [vmem:[%s216_s12] sm:$0xff] (%p885_p3)  ;;  %v231_v2 = vld [vmem:[%s216_s12 + $0x8] sm:$0xff] (%p885_p3) }
  0x13   : > { %v233_v3 = vld [vmem:[%s216_s12 + $0x20] sm:$0xff] (%p885_p3)  ;;  %230 = vst [vmem:[%s213_s13] sm:$0xff] (%p885_p3), %v229_v1  ;;  %v235_v4 = vld [vmem:[%s216_s12 + $0x28] sm:$0xff] (%p885_p3) }
  0x14   : > { %232 = vst [vmem:[%s213_s13 + $0x8] sm:$0xff] %v231_v2 }
  0x15   : > { %234 = vst [vmem:[%s213_s13 + $0x10] sm:$0xff] %v233_v3 }
  0x16   : > { %236 = vst [vmem:[%s213_s13 + $0x18] sm:$0xff] %v235_v4 }
  0x17 PF: > { %242 = sbr.rel (!%p885_p3) target bundleno = 31 (0x1f), region = 59  ;;  %s244_s14 = sand.u32 (%p885_p3), 1, %s812_s24  }
  0x18   : > { %s758_s15 = sshll.u32 (%p885_p3), %s816_s25, 4  ;;  %s704_s16 = sshll.u32 (%p885_p3), %s244_s14, 5 }
  0x19   : > { %s249_s19 = scalar_lea.vmem (%p885_p3), %s946_s1, %s758_s15  ;;  %s246_s20 = scalar_lea.vmem (%p885_p3), [#allocation4], %s704_s16 }
  0x1a   : > { %v262_v5 = vld [vmem:[%s249_s19] sm:$0xff] (%p885_p3)  ;;  %v264_v6 = vld [vmem:[%s249_s19 + $0x8] sm:$0xff] (%p885_p3) }
  0x1b   : > { %v266_v7 = vld [vmem:[%s249_s19 + $0x20] sm:$0xff] (%p885_p3)  ;;  %263 = vst [vmem:[%s246_s20] sm:$0xff] (%p885_p3), %v262_v5  ;;  %v268_v8 = vld [vmem:[%s249_s19 + $0x28] sm:$0xff] (%p885_p3) }
  0x1c   : > { %265 = vst [vmem:[%s246_s20 + $0x8] sm:$0xff] %v264_v6 }
  0x1d   : > { %267 = vst [vmem:[%s246_s20 + $0x10] sm:$0xff] %v266_v7 }
  0x1e   : > { %269 = vst [vmem:[%s246_s20 + $0x18] sm:$0xff] %v268_v8 }
  0x1f PF: > { %p707_p5 = scmp.ge.s32.totalorder %s816_s25, 1  ;;  %p274_p6 = scmp.lt.s32.totalorder %s816_s25, 3 }
  0x21   : > { %p275_p7 = pnand %p707_p5, %p274_p6 }
  0x22   : > { %s281_s21 = sand.u32 (!%p275_p7), 1, %s808_s23   ;;  %s710_s15 = sshll.u32 (!%p275_p7), %s697_s5, 2 }
  0x23   : > { %278 = sbr.rel (%p275_p7) target bundleno = 339 (0x153), region = 82  ;;  %s708_s28 = sshll.u32 (!%p275_p7), %s281_s21, 5 }
  0x24   : > { %s290_s30 = scalar_lea.vmem (!%p275_p7), [#allocation4], %s708_s28  ;;  %s283_s23 = scalar_lea.vmem (!%p275_p7), [#allocation3], %s708_s28 }
  0x25   : > { %p323_p8 = scmp.lt.s32.totalorder (!%p275_p7), %s710_s15, 7 }
  0x28   : > { %v394_v9 = vld [vmem:[%s948_s3 + $0x8] sm:$0xff]  ;;  %v818_v10 = vmov 0   ;;  %v766_v12 = vld [vmem:[%s290_s30 + $0x14] sm:$0xf0]  ;;  %v739_v15 = vld [vmem:[%s290_s30 + $0x18] sm:$0xf0] }
  0x29   : > { %792 = vset.pattern.permute.xlu0 %v818_v10  ;;  %793 = vset.pattern.permute.xlu1 %v818_v10  ;;  %v737_v11 = vld [vmem:[%s290_s30 + $0x8] sm:$0xf]  ;;  %v764_v13 = vld [vmem:[%s290_s30 + $0xc] sm:$0xf]  ;;  %v763_v16 = vld [vmem:[%s290_s30 + $0x4] sm:$0xf] }
  0x2a   : > { %402 = vperm.xlu0 %792, %v394_v9   ;;  %v738_v14 = vor.u32 %v766_v12, %v737_v11  ;;  %v731_v17 = vld [vmem:[%s290_s30 + $0x10] sm:$0xf0]  ;;  %v742_v18 = vor.u32 %v764_v13, %v739_v15  ;;  %v729_v20 = vld [vmem:[%s290_s30] sm:$0xf]  ;;  %v765_v21 = vld [vmem:[%s290_s30 + $0xc] sm:$0xf0] }
  0x2b   : > { %v734_v19 = vor.u32 %v763_v16, %v731_v17  ;;  %v721_v22 = vld [vmem:[%s283_s23 + $0x8] sm:$0xf]  ;;  %v730_v25 = vor.u32 %v765_v21, %v729_v20  ;;  %v762_v26 = vld [vmem:[%s283_s23 + $0x14] sm:$0xf0]  ;;  %v760_v27 = vld [vmem:[%s283_s23 + $0xc] sm:$0xf] }
  0x2c   : > { %v389_v23 = vunpack.c.h.bf16 %v738_v14  ;;  %v385_v24 = vunpack.c.l.bf16 %v738_v14  ;;  %v723_v28 = vld [vmem:[%s283_s23 + $0x18] sm:$0xf0]  ;;  %v390_v29 = vunpack.c.h.bf16 %v742_v18  ;;  %v386_v31 = vunpack.c.l.bf16 %v742_v18  ;;  %v759_v33 = vld [vmem:[%s283_s23 + $0x4] sm:$0xf]  ;;  %v715_v34 = vld [vmem:[%s283_s23 + $0x10] sm:$0xf0] }
  0x2d   : > { %v388_v30 = vunpack.c.h.bf16 %v734_v19  ;;  %v384_v32 = vunpack.c.l.bf16 %v734_v19  ;;  %v713_v35 = vld [vmem:[%s283_s23] sm:$0xf]  ;;  %v387_v36 = vunpack.c.h.bf16 %v730_v25  ;;  %v722_v37 = vor.u32 %v762_v26, %v721_v22  ;;  %v761_v40 = vld [vmem:[%s283_s23 + $0xc] sm:$0xf0]  ;;  %v392_v53 = vld [vmem:[%s947_s2 + $0x8] sm:$0xff]  ;;  %s957_s15 = smov (!%p323_p8, %s710_s15), 7 }
  0x2e   : > { %470 = vmatpush.msra.mxu2 %v389_v23  ;;  %v726_v38 = vor.u32 %v760_v27, %v723_v28  ;;  %v383_v39 = vunpack.c.l.bf16 %v730_v25  ;;  %493 = vmatpush.msra.mxu3 %v390_v29  ;;  %v718_v41 = vor.u32 %v759_v33, %v715_v34  ;;  %v714_v42 = vor.u32 %v761_v40, %v713_v35  ;;  %v391_v49 = vld [vmem:[%s947_s2] sm:$0xff]  ;;  %s325_s5 = scalar_lea.vmem %s951_s6, %s957_s15 }
  0x2f   : > { %447 = vmatpush.msra.mxu1 %v388_v30  ;;  %424 = vmatpush.msra.mxu0 %v387_v36  ;;  %v381_v43 = vunpack.c.h.bf16 %v722_v37  ;;  %v377_v45 = vunpack.c.l.bf16 %v722_v37  ;;  %vm405_vm0 = vcmask 261120   ;;  %v393_v52 = vld [vmem:[%s948_s3] sm:$0xff]  ;;  %vm520_vm1 = vcmask 130048  }
  0x30   : > { %471 = vmatpush.msra.mxu2 %v385_v24  ;;  %v382_v44 = vunpack.c.h.bf16 %v726_v38  ;;  %494 = vmatpush.msra.mxu3 %v386_v31  ;;  %v380_v46 = vunpack.c.h.bf16 %v718_v41  ;;  %v378_v47 = vunpack.c.l.bf16 %v726_v38  ;;  %v379_v48 = vunpack.c.h.bf16 %v714_v42  ;;  %v513_v54 = vld [vmem:[#allocation2] sm:$0x1] }
  0x31   : > { %448 = vmatpush.msra.mxu1 %v384_v32  ;;  %425 = vmatpush.msra.mxu0 %v383_v39  ;;  %v376_v50 = vunpack.c.l.bf16 %v718_v41  ;;  %v375_v51 = vunpack.c.l.bf16 %v714_v42  ;;  %v512_v14 = vld [vmem:[%s949_s4] sm:$0x1]  ;;  %v618_v26 = vlaneseq  ;;  %vm613_vm2 = vcmask 1042434  }
  0x32   : > { %472 = vmatpush.msra.mxu2 %v381_v43  ;;  %495 = vmatpush.msra.mxu3 %v382_v44  ;;  %vm611_vm3 = vcmask 1040384   ;;  %vm615_vm4 = vcmask 1041408  }
  0x33   : > { %449 = vmatpush.msra.mxu1 %v380_v46  ;;  %426 = vmatpush.msra.mxu0 %v379_v48  ;;  %vm620_vm5 = vcmp.lt.s32.totalorder %v618_v26, 512 }
  0x34   : > { %473 = vmatpush.msra.mxu2 %v377_v45  ;;  %496 = vmatpush.msra.mxu3 %v378_v47 }
  0x35   : > { %747 = vmatmul.msk.f32.vlgmr.msra.gmra.mxu2 %vm405_vm0, %v391_v49  ;;  %749 = vmatmul.msk.f32.vlgmr.msra.gmra.mxu3 %vm405_vm0, %v391_v49 }
  0x36   : > { %450 = vmatpush.msra.mxu1 %v376_v50  ;;  %427 = vmatpush.msra.mxu0 %v375_v51 }
  0x37   : > { %745 = vmatmul.msk.f32.vlgmr.msra.gmra.mxu1 %vm405_vm0, %v391_v49  ;;  %743 = vmatmul.msk.f32.vlgmr.msra.gmra.mxu0 %vm405_vm0, %v391_v49 }
  0x38   : > { %397 = vperm.xlu0 %792, %v393_v52   ;;  %516 = vperm.xlu1 %793, %v513_v54  }
  0x3d   : > { %748 = vmatmul.msk.f32.gmra.mxu2 %vm405_vm0, %v392_v53  ;;  %750 = vmatmul.msk.f32.gmra.mxu3 %vm405_vm0, %v392_v53 }
  0x3f   : > { %746 = vmatmul.msk.f32.gmra.mxu1 %vm405_vm0, %v392_v53  ;;  %744 = vmatmul.msk.f32.gmra.mxu0 %vm405_vm0, %v392_v53 }
  0x9c   : > { %v403_v55 = vpop.permute.xlu0 %402 }
  0xaa   : > { %v398_v60 = vpop.permute.xlu0 %397  ;;  %v517_v18 = vpop.permute.xlu1 %516 }
  0xab   : > { %v519_v19 = vperm.slane %v517_v18, 0 }
  0xb4   : > { %v452_v56 = vpop.f32.mrf.mxu1  ;;  %v429_v57 = vpop.f32.mrf.mxu0 }
  0xb5   : > { %v453_v0 = vadd.f32 %v452_v56, %v398_v60  ;;  %v430_v2 = vadd.f32 %v429_v57, %v398_v60 }
  0xb7   : > { %v505_v9 = vmax.f32 %v453_v0, 0.0  ;;  %v504_v12 = vmax.f32 %v430_v2, 0.0 }
  0xb8   : > { %v475_v58 = vpop.f32.mrf.mxu2  ;;  %v498_v59 = vpop.f32.mrf.mxu3 }
  0xb9   : > { %v476_v6 = vadd.f32 %v475_v58, %v398_v60  ;;  %v499_v10 = vadd.f32 %v498_v59, %v398_v60 }
  0xbb   : > { %v506_v16 = vmax.f32 %v476_v6, 0.0  ;;  %v507_v17 = vmax.f32 %v499_v10, 0.0 }
  0xbc   : > { %v455_v61 = vpop.f32.mrf.mxu1  ;;  %v432_v63 = vpop.f32.mrf.mxu0 }
  0xbd   : > { %v456_v62 = vadd.f32 %v455_v61, %v403_v55  ;;  %v433_v1 = vadd.f32 %v432_v63, %v403_v55 }
  0xbf   : > { %v509_v3 = vmax.f32 %v456_v62, 0.0  ;;  %v508_v4 = vmax.f32 %v433_v1, 0.0 }
  0xc0   : > { %v478_v5 = vpop.f32.mrf.mxu2  ;;  %v501_v8 = vpop.f32.mrf.mxu3 }
  0xc1   : > { %v479_v7 = vadd.f32 %v478_v5, %v403_v55  ;;  %558 = vmatpush.msrb.mxu1 %v509_v3  ;;  %v502_v11 = vadd.f32 %v501_v8, %v403_v55  ;;  %538 = vmatpush.msrb.mxu0 %v508_v4 }
  0xc3   : > { %v510_v13 = vmax.f32 %v479_v7, 0.0  ;;  %559 = vmatpush.msrb.mxu1 %v505_v9  ;;  %v511_v15 = vmax.f32 %v502_v11, 0.0  ;;  %539 = vmatpush.msrb.mxu0 %v504_v12 }
  0xc4   : > { %752 = vmatmul.msk.f32.vlgmr.msrb.gmra.mxu1 %vm520_vm1, %v512_v14  ;;  %751 = vmatmul.msk.f32.vlgmr.msrb.gmra.mxu0 %vm520_vm1, %v512_v14 }
  0xc5   : > { %578 = vmatpush.msrb.mxu2 %v510_v13  ;;  %598 = vmatpush.msrb.mxu3 %v511_v15 }
  0xc7   : > { %579 = vmatpush.msrb.mxu2 %v506_v16  ;;  %599 = vmatpush.msrb.mxu3 %v507_v17 }
  0xc8   : > { %753 = vmatmul.msk.f32.vlgmr.msrb.gmra.mxu2 %vm520_vm1, %v512_v14  ;;  %754 = vmatmul.msk.f32.vlgmr.msrb.gmra.mxu3 %vm520_vm1, %v512_v14 }
 0x141   : > { %v561_v20 = vpop.f32.mrf.mxu1  ;;  %v541_v22 = vpop.f32.mrf.mxu0 }
 0x142   : > { %v562_v21 = vadd.f32 %v561_v20, %v519_v19  ;;  %v542_v29 = vadd.f32 %v541_v22, %v519_v19 }
 0x144   : > { %v608_v27 = vrot.slane %v562_v21, 7 }
 0x146   : > { %v612_v33 = vsel %vm611_vm3, %v542_v29, %v608_v27 }
 0x14b   : > { %v581_v23 = vpop.f32.mrf.mxu2  ;;  %v601_v25 = vpop.f32.mrf.mxu3 }
 0x14c   : > { %v582_v24 = vadd.f32 %v581_v23, %v519_v19  ;;  %v602_v28 = vadd.f32 %v601_v25, %v519_v19 }
 0x14e   : > { %v609_v30 = vrot.slane %v582_v24, 6  ;;  %v610_v31 = vrot.slane %v602_v28, 5 }
 0x150   : > { %v614_v32 = vsel %vm613_vm2, %v609_v30, %v610_v31 }
 0x151   : > { %v616_v34 = vsel %vm615_vm4, %v612_v33, %v614_v32 }
 0x152   : > { %622 = vst.msk [vmem:[%s325_s5] sm:$0xf] %vm620_vm5, %v616_v34 }
 0x153 PF: > { %p15_p9 = scmp.ge.s32.totalorder %s874_s26, 4   ;;  %s953_s23 = smov %s812_s24 }
 0x154   : > { %s954_s24 = smov %s883_s29  ;;  %s955_s25 = smov %s874_s26 }
 0x155   :  { %17 = sbr.rel (!%p15_p9) target bundleno = 5 (0x5), region = 133 }

</bundles_post_ra>
